<compile_context>
chip_gen: v7x
topology: tpu7x:2x2x1
jax: 0.10.0
libtpu: 0.0.40
codegen_flags: <defaults>
</compile_context>

<pallas_src>
import functools

import jax
import jax.numpy as jnp
from jax.experimental import pallas as pl
from jax.experimental.pallas import tpu as pltpu


# ------------------------------ Pallas kernels ------------------------------

def _expand_seg_ln_kernel(x_ref, we_ref, wm_ref, sb_ref, sa_ref, g_ref, b_ref,
                          o_ref, *, eps):
    """Fused PatchExpanding Linear + per-segment LayerNorm.

    xe    = x @ We                                   (bm, 4*dim)
    m_seg = x @ (We @ seg_avg)                       (bm, nseg)   mean folded into weight
    mean  = m_seg @ seg_bcast                        (bm, 4*dim)
    v_seg = (xe - mean)^2 @ seg_avg                  (bm, nseg)   biased var (PyTorch LN)
    y     = (xe - mean) * (rsqrt(v_seg+eps) @ seg_bcast) * gamma + beta
    """
    x = x_ref[...]
    xe = jnp.dot(x, we_ref[...], preferred_element_type=jnp.float32)
    m_seg = jnp.dot(x, wm_ref[...], preferred_element_type=jnp.float32)
    mean = jnp.dot(m_seg, sb_ref[...], preferred_element_type=jnp.float32)
    xc = xe - mean
    v_seg = jnp.dot(xc * xc, sa_ref[...], preferred_element_type=jnp.float32)
    rstd = jnp.dot(jax.lax.rsqrt(v_seg + eps), sb_ref[...],
                   preferred_element_type=jnp.float32)
    y = xc * rstd * g_ref[...] + b_ref[...]
    o_ref[...] = y.astype(o_ref.dtype)


def _concat_linear_kernel(xn_ref, sk_ref, w1_ref, w2_ref, b_ref, o_ref):
    """Fused concat + Linear: y = x_up @ W1 + skip @ W2 + b (lane-packed)."""
    acc = jnp.dot(xn_ref[...], w1_ref[...], preferred_element_type=jnp.float32)
    acc = acc + jnp.dot(sk_ref[...], w2_ref[...], preferred_element_type=jnp.float32)
    o_ref[...] = (acc + b_ref[...]).astype(o_ref.dtype)


# ------------------------------ helpers ------------------------------

def _round_up(n, m):
    return ((n + m - 1) // m) * m


def _vmem_budget_bytes():
    """Generation-aware VMEM budget (v5e/v6e: 128 MiB, v7x: 64 MiB physical)."""
    try:
        cap = int(pltpu.get_tpu_info().vmem_capacity_bytes)
    except Exception:
        cap = 64 * 1024 * 1024
    return min((cap * 3) // 4, 96 * 1024 * 1024)


def _compiler_params(dimension_semantics):
    return pltpu.CompilerParams(
        dimension_semantics=dimension_semantics,
        vmem_limit_bytes=_vmem_budget_bytes(),
    )


def _pick_block_rows(n_rows, target):
    """Largest multiple-of-8 divisor of n_rows that is <= target, preferring
    >= 4 grid steps (2 pipelined steps per v7x TensorCore), then >= 2, then 1.
    Returns None when no multiple-of-8 divisor exists (the caller pads)."""
    limit = max(8, min(target, n_rows))
    cands = [bm for bm in range(8, limit + 1, 8) if n_rows % bm == 0]
    if not cands:
        return None
    for min_steps in (4, 2, 1):
        ok = [bm for bm in cands if n_rows // bm >= min_steps]
        if ok:
            return max(ok)
    return max(cands)


def _row_blocking(n_rows, row_bytes, fixed_bytes):
    """Pick (block_rows, padded_rows) sized to this generation's VMEM budget."""
    budget = _vmem_budget_bytes()
    avail = max(budget - 2 * fixed_bytes, budget // 4)
    target = int(max(64, min(1024, avail // max(row_bytes, 1))))
    bm = _pick_block_rows(n_rows, target)
    if bm is not None:
        return bm, n_rows
    # Awkward row count: pad to a multiple-of-8 block instead of degrading
    # to an unaligned block shape (keeps the (8,128) rule satisfied).
    bm = max(8, min(_round_up(n_rows, 8), (target // 8) * 8))
    return bm, _round_up(n_rows, bm)


def _choose_fold(m_rows, c_in, c_out):
    """Pack `fold` consecutive voxels into the lane axis so loads/stores are
    lane-dense and the packed width fills a 256-wide v6e/v7x MXU tile.  Wide
    channels (>=128) take the dense path (no block-diagonal FLOP overhead)."""
    if min(c_in, c_out) >= 128:
        return 1
    fold = 1
    while fold * min(c_in, c_out) < 256 and fold < 16:
        fold *= 2
    while fold > 1 and m_rows % fold:
        fold //= 2
    return fold


# ------------------------------ Pallas wrappers ------------------------------

def pallas_expand_seg_layernorm(x2d, w_expand, gamma, beta, eps=1e-5):
    """x2d: (N, dim); w_expand: (dim, 4*dim); gamma/beta: (dim//2,).
    Returns per-(dim//2)-segment LayerNorm of (x2d @ w_expand): (N, 4*dim)."""
    N, dim = x2d.shape
    out_dim = w_expand.shape[1]
    c = gamma.shape[0]
    nseg = out_dim // c
    assert nseg * c == out_dim

    f32 = jnp.float32
    seg_id = jnp.arange(out_dim) // c                                    # (4dim,)
    onehot = (seg_id[:, None] == jnp.arange(nseg)[None, :]).astype(f32)  # (4dim, nseg)
    seg_avg = onehot / float(c)       # (4dim, nseg): per-segment mean reducer
    seg_bcast = onehot.T              # (nseg, 4dim): broadcast back over segment lanes
    w_e = w_expand.astype(x2d.dtype)
    w_mean = (w_expand.astype(f32) @ seg_avg).astype(x2d.dtype)          # (dim, nseg)
    g_t = jnp.tile(gamma.astype(f32), nseg).reshape(1, out_dim)
    b_t = jnp.tile(beta.astype(f32), nseg).reshape(1, out_dim)

    isz = x2d.dtype.itemsize
    row_bytes = 2 * (dim + out_dim) * isz + 5 * out_dim * 4       # dbuf I/O + f32 temps
    fixed_bytes = dim * (out_dim + nseg) * isz + (2 * nseg * out_dim + 2 * out_dim) * 4
    bm, n_pad = _row_blocking(N, row_bytes, fixed_bytes)
    x_in = x2d if n_pad == N else jnp.pad(x2d, ((0, n_pad - N), (0, 0)))

    out = pl.pallas_call(
        functools.partial(_expand_seg_ln_kernel, eps=eps),
        out_shape=jax.ShapeDtypeStruct((n_pad, out_dim), x2d.dtype),
        grid=(n_pad // bm,),
        in_specs=[
            pl.BlockSpec((bm, dim), lambda i: (i, 0)),
            pl.BlockSpec((dim, out_dim), lambda i: (0, 0)),
            pl.BlockSpec((dim, nseg), lambda i: (0, 0)),
            pl.BlockSpec((nseg, out_dim), lambda i: (0, 0)),
            pl.BlockSpec((out_dim, nseg), lambda i: (0, 0)),
            pl.BlockSpec((1, out_dim), lambda i: (0, 0)),
            pl.BlockSpec((1, out_dim), lambda i: (0, 0)),
        ],
        out_specs=pl.BlockSpec((bm, out_dim), lambda i: (i, 0)),
        compiler_params=_compiler_params(("parallel",)),
    )(x_in, w_e, w_mean, seg_bcast, seg_avg, g_t, b_t)
    return out if n_pad == N else out[:N]


def pallas_concat_linear(xn2d, sk2d, w_cb, b_cb):
    """Fused torch.cat([x_up, skip], -1) @ W_cb + b without materializing the
    concat.  xn2d, sk2d: (M, c); w_cb: (2c, c_out) pre-transposed; b_cb: (c_out,)."""
    M, c_in = xn2d.shape
    c_out = w_cb.shape[1]
    assert w_cb.shape[0] == 2 * c_in
    dt = xn2d.dtype
    w1 = w_cb[:c_in, :].astype(dt)    # x_up half  (concat order: [x_up, skip])
    w2 = w_cb[c_in:, :].astype(dt)    # skip half

    fold = _choose_fold(M, c_in, c_out)
    rows = M // fold
    kin, kout = fold * c_in, fold * c_out
    xn_f = xn2d.reshape(rows, kin)    # free row-major reshape (voxel lane-packing)
    sk_f = sk2d.reshape(rows, kin)
    if fold > 1:
        eye = jnp.eye(fold, dtype=dt)
        w1_f = jnp.kron(eye, w1)      # block-diagonal (kin, kout)
        w2_f = jnp.kron(eye, w2)
        b_f = jnp.tile(b_cb.astype(jnp.float32), fold).reshape(1, kout)
    else:
        w1_f, w2_f = w1, w2
        b_f = b_cb.astype(jnp.float32).reshape(1, kout)

    isz = dt.itemsize
    row_bytes = 2 * (2 * kin + kout) * isz + 2 * kout * 4
    fixed_bytes = 2 * kin * kout * isz + kout * 4
    bm, rows_pad = _row_blocking(rows, row_bytes, fixed_bytes)
    if rows_pad != rows:
        xn_f = jnp.pad(xn_f, ((0, rows_pad - rows), (0, 0)))
        sk_f = jnp.pad(sk_f, ((0, rows_pad - rows), (0, 0)))

    out = pl.pallas_call(
        _concat_linear_kernel,
        out_shape=jax.ShapeDtypeStruct((rows_pad, kout), dt),
        grid=(rows_pad // bm,),
        in_specs=[
            pl.BlockSpec((bm, kin), lambda i: (i, 0)),
            pl.BlockSpec((bm, kin), lambda i: (i, 0)),
            pl.BlockSpec((kin, kout), lambda i: (0, 0)),
            pl.BlockSpec((kin, kout), lambda i: (0, 0)),
            pl.BlockSpec((1, kout), lambda i: (0, 0)),
        ],
        out_specs=pl.BlockSpec((bm, kout), lambda i: (i, 0)),
        compiler_params=_compiler_params(("parallel",)),
    )(xn_f, sk_f, w1_f, w2_f, b_f)
    if rows_pad != rows:
        out = out[:rows]
    return out.reshape(M, c_out)


# ------------------------------ Module forward ------------------------------

def init_params(key, dim):
    """Deterministic synthetic parameters matching the module's __init__ shapes."""
    k1, k2, k3 = jax.random.split(key, 3)
    return {
        # PatchExpanding.expand: nn.Linear(dim, 4*dim, bias=False), pre-transposed.
        "w_expand": (jax.random.normal(k1, (dim, 4 * dim), jnp.float32)
                     * (1.0 / jnp.sqrt(dim))),
        # PatchExpanding.norm: nn.LayerNorm(dim // 2)
        "ln_up_g": jnp.ones((dim // 2,), jnp.float32),
        "ln_up_b": jnp.zeros((dim // 2,), jnp.float32),
        # concat_back_dim: nn.Linear(dim, dim // 2) with bias, pre-transposed.
        "w_cb": (jax.random.normal(k2, (dim, dim // 2), jnp.float32)
                 * (1.0 / jnp.sqrt(dim))),
        "b_cb": (jax.random.normal(k3, (dim // 2,), jnp.float32) * 0.01),
    }


def vmamba_layer_up_forward(x, skip, params):
    B, dim, D, H, W = x.shape
    c = dim // 2

    # x.permute(0, 2, 3, 4, 1) / skip.permute(0, 2, 3, 4, 1)
    xcl = jnp.transpose(x, (0, 2, 3, 4, 1)).reshape(B * D * H * W, dim)
    skcl = jnp.transpose(skip, (0, 2, 3, 4, 1)).reshape(-1, c)

    # ---- PatchExpanding: Linear(dim->4*dim, no bias) + LayerNorm(dim//2),
    #      fused in one Pallas kernel (LN applied per c-wide segment). ----
    xe = pallas_expand_seg_layernorm(
        xcl, params["w_expand"], params["ln_up_g"], params["ln_up_b"])

    # rearrange 'b h w d (p1 p2 p3 c) -> b (h p1) (w p2) (d p3) c', p1=p2=p3=2
    xn = xe.reshape(B, D, H, W, 2, 2, 2, c)
    xn = jnp.transpose(xn, (0, 1, 4, 2, 5, 3, 6, 7)).reshape(-1, c)

    # TODO(synk): VSSBlock (self.mamba, `depths` blocks) source is not provided
    # in the reference; treated as identity rather than faked.

    # ---- fused concat + concat_back_dim: y = x_up @ W1 + skip @ W2 + b ----
    y = pallas_concat_linear(xn, skcl, params["w_cb"], params["b_cb"])  # (M, c)

    # x.view(B, -1, D, H, W): raw memory reinterpretation of the contiguous
    # channels-last buffer, reproduced exactly by a row-major reshape.
    return y.reshape(B, -1, 2 * D, 2 * H, 2 * W)


# ------------------------------ reference (pure JAX) ------------------------------

def _ref_forward(x, skip, p, eps=1e-5):
    B, dim, D, H, W = x.shape
    c = dim // 2
    xcl = jnp.transpose(x, (0, 2, 3, 4, 1))
    xe = xcl @ p["w_expand"]
    xn = xe.reshape(B, D, H, W, 2, 2, 2, c)
    xn = jnp.transpose(xn, (0, 1, 4, 2, 5, 3, 6, 7)).reshape(B, 2 * D, 2 * H, 2 * W, c)
    mu = xn.mean(-1, keepdims=True)
    var = ((xn - mu) ** 2).mean(-1, keepdims=True)
    xn = (xn - mu) * jax.lax.rsqrt(var + eps) * p["ln_up_g"] + p["ln_up_b"]
    skl = jnp.transpose(skip, (0, 2, 3, 4, 1))
    cat = jnp.concatenate([xn, skl], -1)
    y = cat @ p["w_cb"] + p["b_cb"]
    return y.reshape(B, -1, 2 * D, 2 * H, 2 * W)


# ------------------------------ main ------------------------------

if __name__ == "__main__":
    key = jax.random.PRNGKey(0)
    dim = 32
    B, D, H, W = 2, 4, 4, 4

    kx, ks, kp = jax.random.split(key, 3)
    # NCDHW, matching the PyTorch module's expected inputs.
    x = jax.random.normal(kx, (B, dim, D, H, W), jnp.float32)
    skip = jax.random.normal(ks, (B, dim // 2, 2 * D, 2 * H, 2 * W), jnp.float32)
    params = init_params(kp, dim)

    fwd = jax.jit(vmamba_layer_up_forward)
    out = jax.block_until_ready(fwd(x, skip, params))
    assert out.shape == (B, dim // 2, 2 * D, 2 * H, 2 * W), out.shape

    with jax.default_matmul_precision("float32"):
        ref = _ref_forward(x, skip, params)
    max_err = float(jnp.max(jnp.abs(out - ref)))
    assert jnp.allclose(out, ref, atol=1e-2, rtol=1e-2), max_err

    print("KERNEL_OK")
</pallas_src>

<mosaic_0001>
module attributes {stable_mosaic.version = 11 : i64} {
  func.func @_expand_seg_ln_kernel(%arg0: i32, %arg1: memref<32x32xf32, #tpu.memory_space<vmem>>, %arg2: memref<32x128xf32, #tpu.memory_space<vmem>>, %arg3: memref<32x8xf32, #tpu.memory_space<vmem>>, %arg4: memref<8x128xf32, #tpu.memory_space<vmem>>, %arg5: memref<128x8xf32, #tpu.memory_space<vmem>>, %arg6: memref<1x128xf32, #tpu.memory_space<vmem>>, %arg7: memref<1x128xf32, #tpu.memory_space<vmem>>, %arg8: memref<32x128xf32, #tpu.memory_space<vmem>>) attributes {dimension_semantics = [#tpu.dimension_semantics<parallel>], iteration_bounds = array<i64: 4>, scalar_prefetch = 0 : i64, scratch_operands = 0 : i64, tpu.core_type = #tpu.core_type<tc>, window_params = [{transform_indices = @transform_0, window_bounds = array<i64: 32, 32>}, {pipeline_mode = #tpu.pipeline_mode<synchronous>, transform_indices = @transform_1, window_bounds = array<i64: 32, 128>}, {pipeline_mode = #tpu.pipeline_mode<synchronous>, transform_indices = @transform_2, window_bounds = array<i64: 32, 8>}, {pipeline_mode = #tpu.pipeline_mode<synchronous>, transform_indices = @transform_3, window_bounds = array<i64: 8, 128>}, {pipeline_mode = #tpu.pipeline_mode<synchronous>, transform_indices = @transform_4, window_bounds = array<i64: 128, 8>}, {pipeline_mode = #tpu.pipeline_mode<synchronous>, transform_indices = @transform_5, window_bounds = array<i64: 1, 128>}, {pipeline_mode = #tpu.pipeline_mode<synchronous>, transform_indices = @transform_6, window_bounds = array<i64: 1, 128>}, {transform_indices = @transform_7, window_bounds = array<i64: 32, 128>}]} {
    %c0 = arith.constant 0 : index
    %c0_0 = arith.constant 0 : index
    %0 = vector.load %arg1[%c0, %c0_0] : memref<32x32xf32, #tpu.memory_space<vmem>>, vector<32x32xf32>
    %c0_1 = arith.constant 0 : index
    %c0_2 = arith.constant 0 : index
    %1 = vector.load %arg2[%c0_1, %c0_2] : memref<32x128xf32, #tpu.memory_space<vmem>>, vector<32x128xf32>
    %cst = arith.constant dense<0.000000e+00> : vector<32x128xf32>
    %2 = tpu.matmul %0, %1, %cst {dimension_numbers = #tpu.dot_dimension_numbers<[1], [0], [0], [1], [0, 0, 1, 1], [], []>} : vector<32x32xf32>, vector<32x128xf32>, vector<32x128xf32> -> vector<32x128xf32>
    %c0_3 = arith.constant 0 : index
    %c0_4 = arith.constant 0 : index
    %3 = vector.load %arg3[%c0_3, %c0_4] : memref<32x8xf32, #tpu.memory_space<vmem>>, vector<32x8xf32>
    %cst_5 = arith.constant dense<0.000000e+00> : vector<32x8xf32>
    %4 = tpu.matmul %0, %3, %cst_5 {dimension_numbers = #tpu.dot_dimension_numbers<[1], [0], [0], [1], [0, 0, 1, 1], [], []>} : vector<32x32xf32>, vector<32x8xf32>, vector<32x8xf32> -> vector<32x8xf32>
    %c0_6 = arith.constant 0 : index
    %c0_7 = arith.constant 0 : index
    %5 = vector.load %arg4[%c0_6, %c0_7] : memref<8x128xf32, #tpu.memory_space<vmem>>, vector<8x128xf32>
    %cst_8 = arith.constant dense<0.000000e+00> : vector<32x128xf32>
    %6 = tpu.matmul %4, %5, %cst_8 {dimension_numbers = #tpu.dot_dimension_numbers<[1], [0], [0], [1], [0, 0, 1, 1], [], []>} : vector<32x8xf32>, vector<8x128xf32>, vector<32x128xf32> -> vector<32x128xf32>
    %7 = arith.subf %2, %6 : vector<32x128xf32>
    %8 = arith.mulf %7, %7 : vector<32x128xf32>
    %c0_9 = arith.constant 0 : index
    %c0_10 = arith.constant 0 : index
    %9 = vector.load %arg5[%c0_9, %c0_10] : memref<128x8xf32, #tpu.memory_space<vmem>>, vector<128x8xf32>
    %cst_11 = arith.constant dense<0.000000e+00> : vector<32x8xf32>
    %10 = tpu.matmul %8, %9, %cst_11 {dimension_numbers = #tpu.dot_dimension_numbers<[1], [0], [0], [1], [0, 0, 1, 1], [], []>} : vector<32x128xf32>, vector<128x8xf32>, vector<32x8xf32> -> vector<32x8xf32>
    %cst_12 = arith.constant 9.99999974E-6 : f32
    %11 = vector.broadcast %cst_12 : f32 to vector<32x8xf32>
    %12 = arith.addf %10, %11 : vector<32x8xf32>
    %13 = math.rsqrt %12 : vector<32x8xf32>
    %c0_13 = arith.constant 0 : index
    %c0_14 = arith.constant 0 : index
    %14 = vector.load %arg4[%c0_13, %c0_14] : memref<8x128xf32, #tpu.memory_space<vmem>>, vector<8x128xf32>
    %cst_15 = arith.constant dense<0.000000e+00> : vector<32x128xf32>
    %15 = tpu.matmul %13, %14, %cst_15 {dimension_numbers = #tpu.dot_dimension_numbers<[1], [0], [0], [1], [0, 0, 1, 1], [], []>} : vector<32x8xf32>, vector<8x128xf32>, vector<32x128xf32> -> vector<32x128xf32>
    %16 = arith.mulf %7, %15 : vector<32x128xf32>
    %c0_16 = arith.constant 0 : index
    %c0_17 = arith.constant 0 : index
    %17 = vector.load %arg6[%c0_16, %c0_17] : memref<1x128xf32, #tpu.memory_space<vmem>>, vector<1x128xf32>
    %18 = vector.broadcast %17 : vector<1x128xf32> to vector<32x128xf32>
    %19 = arith.mulf %16, %18 : vector<32x128xf32>
    %c0_18 = arith.constant 0 : index
    %c0_19 = arith.constant 0 : index
    %20 = vector.load %arg7[%c0_18, %c0_19] : memref<1x128xf32, #tpu.memory_space<vmem>>, vector<1x128xf32>
    %21 = vector.broadcast %20 : vector<1x128xf32> to vector<32x128xf32>
    %22 = arith.addf %19, %21 : vector<32x128xf32>
    %c0_20 = arith.constant 0 : index
    %c0_21 = arith.constant 0 : index
    %23 = vector.load %arg8[%c0_20, %c0_21] : memref<32x128xf32, #tpu.memory_space<vmem>>, vector<32x128xf32>
    tpu.vector_store %arg8[%c0_20, %c0_21], %22 {strides = array<i32>} : memref<32x128xf32, #tpu.memory_space<vmem>>, vector<32x128xf32>,
    return
  }
  func.func @transform_0(%arg0: i32) -> (i32, i32) {
    %c0_i32 = arith.constant 0 : i32
    %c0_i32_0 = arith.constant 0 : i32
    return %arg0, %c0_i32 : i32, i32
  }
  func.func @transform_1(%arg0: i32) -> (i32, i32) {
    %c0_i32 = arith.constant 0 : i32
    %c0_i32_0 = arith.constant 0 : i32
    %c0_i32_1 = arith.constant 0 : i32
    return %c0_i32, %c0_i32_0 : i32, i32
  }
  func.func @transform_2(%arg0: i32) -> (i32, i32) {
    %c0_i32 = arith.constant 0 : i32
    %c0_i32_0 = arith.constant 0 : i32
    %c0_i32_1 = arith.constant 0 : i32
    return %c0_i32, %c0_i32_0 : i32, i32
  }
  func.func @transform_3(%arg0: i32) -> (i32, i32) {
    %c0_i32 = arith.constant 0 : i32
    %c0_i32_0 = arith.constant 0 : i32
    %c0_i32_1 = arith.constant 0 : i32
    return %c0_i32, %c0_i32_0 : i32, i32
  }
  func.func @transform_4(%arg0: i32) -> (i32, i32) {
    %c0_i32 = arith.constant 0 : i32
    %c0_i32_0 = arith.constant 0 : i32
    %c0_i32_1 = arith.constant 0 : i32
    return %c0_i32, %c0_i32_0 : i32, i32
  }
  func.func @transform_5(%arg0: i32) -> (i32, i32) {
    %c0_i32 = arith.constant 0 : i32
    %c0_i32_0 = arith.constant 0 : i32
    %c0_i32_1 = arith.constant 0 : i32
    return %c0_i32, %c0_i32_0 : i32, i32
  }
  func.func @transform_6(%arg0: i32) -> (i32, i32) {
    %c0_i32 = arith.constant 0 : i32
    %c0_i32_0 = arith.constant 0 : i32
    %c0_i32_1 = arith.constant 0 : i32
    return %c0_i32, %c0_i32_0 : i32, i32
  }
  func.func @transform_7(%arg0: i32) -> (i32, i32) {
    %c0_i32 = arith.constant 0 : i32
    %c0_i32_0 = arith.constant 0 : i32
    return %arg0, %c0_i32 : i32, i32
  }
}

module attributes {stable_mosaic.version = 11 : i64} {
  func.func @_concat_linear_kernel(%arg0: i32, %arg1: memref<16x256xf32, #tpu.memory_space<vmem>>, %arg2: memref<16x256xf32, #tpu.memory_space<vmem>>, %arg3: memref<256x256xf32, #tpu.memory_space<vmem>>, %arg4: memref<256x256xf32, #tpu.memory_space<vmem>>, %arg5: memref<1x256xf32, #tpu.memory_space<vmem>>, %arg6: memref<16x256xf32, #tpu.memory_space<vmem>>) attributes {dimension_semantics = [#tpu.dimension_semantics<parallel>], iteration_bounds = array<i64: 4>, scalar_prefetch = 0 : i64, scratch_operands = 0 : i64, tpu.core_type = #tpu.core_type<tc>, window_params = [{transform_indices = @transform_0, window_bounds = array<i64: 16, 256>}, {transform_indices = @transform_1, window_bounds = array<i64: 16, 256>}, {pipeline_mode = #tpu.pipeline_mode<synchronous>, transform_indices = @transform_2, window_bounds = array<i64: 256, 256>}, {pipeline_mode = #tpu.pipeline_mode<synchronous>, transform_indices = @transform_3, window_bounds = array<i64: 256, 256>}, {pipeline_mode = #tpu.pipeline_mode<synchronous>, transform_indices = @transform_4, window_bounds = array<i64: 1, 256>}, {transform_indices = @transform_5, window_bounds = array<i64: 16, 256>}]} {
    %c0 = arith.constant 0 : index
    %c0_0 = arith.constant 0 : index
    %0 = vector.load %arg1[%c0, %c0_0] : memref<16x256xf32, #tpu.memory_space<vmem>>, vector<16x256xf32>
    %c0_1 = arith.constant 0 : index
    %c0_2 = arith.constant 0 : index
    %1 = vector.load %arg3[%c0_1, %c0_2] : memref<256x256xf32, #tpu.memory_space<vmem>>, vector<256x256xf32>
    %cst = arith.constant dense<0.000000e+00> : vector<16x256xf32>
    %2 = tpu.matmul %0, %1, %cst {dimension_numbers = #tpu.dot_dimension_numbers<[1], [0], [0], [1], [0, 0, 1, 1], [], []>} : vector<16x256xf32>, vector<256x256xf32>, vector<16x256xf32> -> vector<16x256xf32>
    %c0_3 = arith.constant 0 : index
    %c0_4 = arith.constant 0 : index
    %3 = vector.load %arg2[%c0_3, %c0_4] : memref<16x256xf32, #tpu.memory_space<vmem>>, vector<16x256xf32>
    %c0_5 = arith.constant 0 : index
    %c0_6 = arith.constant 0 : index
    %4 = vector.load %arg4[%c0_5, %c0_6] : memref<256x256xf32, #tpu.memory_space<vmem>>, vector<256x256xf32>
    %cst_7 = arith.constant dense<0.000000e+00> : vector<16x256xf32>
    %5 = tpu.matmul %3, %4, %cst_7 {dimension_numbers = #tpu.dot_dimension_numbers<[1], [0], [0], [1], [0, 0, 1, 1], [], []>} : vector<16x256xf32>, vector<256x256xf32>, vector<16x256xf32> -> vector<16x256xf32>
    %6 = arith.addf %2, %5 : vector<16x256xf32>
    %c0_8 = arith.constant 0 : index
    %c0_9 = arith.constant 0 : index
    %7 = vector.load %arg5[%c0_8, %c0_9] : memref<1x256xf32, #tpu.memory_space<vmem>>, vector<1x256xf32>
    %8 = vector.broadcast %7 : vector<1x256xf32> to vector<16x256xf32>
    %9 = arith.addf %6, %8 : vector<16x256xf32>
    %c0_10 = arith.constant 0 : index
    %c0_11 = arith.constant 0 : index
    %10 = vector.load %arg6[%c0_10, %c0_11] : memref<16x256xf32, #tpu.memory_space<vmem>>, vector<16x256xf32>
    tpu.vector_store %arg6[%c0_10, %c0_11], %9 {strides = array<i32>} : memref<16x256xf32, #tpu.memory_space<vmem>>, vector<16x256xf32>,
    return
  }
  func.func @transform_0(%arg0: i32) -> (i32, i32) {
    %c0_i32 = arith.constant 0 : i32
    %c0_i32_0 = arith.constant 0 : i32
    return %arg0, %c0_i32 : i32, i32
  }
  func.func @transform_1(%arg0: i32) -> (i32, i32) {
    %c0_i32 = arith.constant 0 : i32
    %c0_i32_0 = arith.constant 0 : i32
    return %arg0, %c0_i32 : i32, i32
  }
  func.func @transform_2(%arg0: i32) -> (i32, i32) {
    %c0_i32 = arith.constant 0 : i32
    %c0_i32_0 = arith.constant 0 : i32
    %c0_i32_1 = arith.constant 0 : i32
    return %c0_i32, %c0_i32_0 : i32, i32
  }
  func.func @transform_3(%arg0: i32) -> (i32, i32) {
    %c0_i32 = arith.constant 0 : i32
    %c0_i32_0 = arith.constant 0 : i32
    %c0_i32_1 = arith.constant 0 : i32
    return %c0_i32, %c0_i32_0 : i32, i32
  }
  func.func @transform_4(%arg0: i32) -> (i32, i32) {
    %c0_i32 = arith.constant 0 : i32
    %c0_i32_0 = arith.constant 0 : i32
    %c0_i32_1 = arith.constant 0 : i32
    return %c0_i32, %c0_i32_0 : i32, i32
  }
  func.func @transform_5(%arg0: i32) -> (i32, i32) {
    %c0_i32 = arith.constant 0 : i32
    %c0_i32_0 = arith.constant 0 : i32
    return %arg0, %c0_i32 : i32, i32
  }
}

</mosaic_0001>

<bundles_post_ra>
// kernel: tile.18
= control target key start
LH: loop header
LB: loop body
LE: loop exit
PB: predicated region body
PF: predicated region fallthrough
CT: control target
= control target key end

     0   :  { %2 = vsyncpa [#allocation1], 0  ;;  %s44_s6 = smov [#allocation0]   ;;  %s70_s0 = inlined_call_operand.hbm [shape: f32[16], index: 0, kind: input, shape index: {}]   ;;  %s71_s1 = inlined_call_operand.vmem [shape: f32[8,16], index: 1, kind: output, shape index: {}]  }
   0x1   :  { %s9_s7 = sshll.u32 %s44_s6, 4  ;;  %s20_s10 = scalar_lea.hbm %s70_s0, 16  ;;  %s10_s7 = int_to_ptr.vmem [resolvable:$true] %s9_s7 }
   0x2   :  { %p21_p0 = scmp.ne.s32.totalorder %s70_s0, %s20_s10  ;;  %p24_p1 = scmp.lt.u32.totalorder %s20_s10, %s70_s0 }
   0x4   :  { %p26_p2 = pnand %p24_p1, %p21_p0 }
   0x6   :  { %29 = shalt.err (!%p26_p2)
}
   0x7   :  { %s30_s15 = scalar_lea.vmem %s10_s7, 16  ;;  %s34_s16 = scalar_lea.vmem %s10_s7, 32 }
   0x8   :  { %p31_p3 = scmp.ne.s32.totalorder %s10_s7, %s30_s15  ;;  %p35_p4 = scmp.lt.s32.totalorder %s10_s7, %s10_s7 }
   0x9   :  { %p36_p5 = scmp.lt.s32.totalorder %s34_s16, %s30_s15 }
   0xb   :  { %p37_p6 = por %p36_p5, %p35_p4 }
   0xd   :  { %p38_p7 = pnand %p37_p6, %p31_p3 }
   0xf   :  { %41 = shalt.err (!%p38_p7)
}
  0x10   :  { %12 = dma.hbm_to_vmem [thread:$0]  %s70_s0, 16, %s10_s7, [#allocation1]  }
  0x11   :  { %42 = dma.done.wait [#allocation1], 16  }
  0x12   :  { %43 = vsyncadd [#allocation1], 4294967280  ;;  %v16_v0 = vld [vmem:[#allocation0] ss:$0 sm:$0xff] }
  0x13   :  { %17 = vst [vmem:[%s71_s1] sm:$0xff] %v16_v0 }
  0x14   :  { %18 = vsyncpa [#allocation1], 1 }

// kernel: tile.19
= control target key start
LH: loop header
LB: loop body
LE: loop exit
PB: predicated region body
PF: predicated region fallthrough
CT: control target
= control target key end

     0   :  { %s67_s10 = smov 112   ;;  %s68_s11 = smov 80   ;;  %vm3_vm0 = vcmask 130048   ;;  %vm9_vm1 = vcmask 1048448   ;;  %vm15_vm2 = vcmask 917248   ;;  %vm21_vm3 = vcmask 786048   ;;  %s111_s0 = inlined_call_operand.vmem [shape: f32[8,16], index: 0, kind: input, shape index: {}]   ;;  %s112_s1 = inlined_call_operand.vmem [shape: f32[1,128], index: 1, kind: output, shape index: {}]  }
   0x1   :  { %v53_v0 = vld [vmem:[%s111_s0 + $0x7] sm:$0x1]   ;;  %v55_v1 = vld [vmem:[%s111_s0 + $0x5] sm:$0x1]   ;;  %v54_v2 = vld [vmem:[%s111_s0 + $0x6] sm:$0x1]  }
   0x2   :  { %7 = vrot.lane.b32.xlu0 %v53_v0, %s67_s10  ;;  %19 = vrot.lane.b32.xlu1 %v55_v1, %s68_s11  ;;  %v56_v3 = vld [vmem:[%s111_s0 + $0x4] sm:$0x1]   ;;  %v2_v4 = vld [vmem:[%s111_s0] sm:$0x1]   ;;  %s69_s18 = smov 96   ;;  %s70_s19 = smov 64  }
   0x3   :  { %4 = vst.msk [vmem:[#allocation0] sm:$0x1] %vm3_vm0, %v2_v4   ;;  %v57_v5 = vld [vmem:[%s111_s0 + $0x3] sm:$0x1]   ;;  %v58_v6 = vld [vmem:[%s111_s0 + $0x2] sm:$0x1]  }
   0x4   :  { %s71_s24 = smov 48   ;;  %s72_s25 = smov 32   ;;  %v59_v7 = vld [vmem:[%s111_s0 + $0x1] sm:$0x1]   ;;  %vm27_vm4 = vcmask 654848   ;;  %vm33_vm5 = vcmask 523648  }
   0x5   :  { %s73_s0 = smov 16   ;;  %vm39_vm6 = vcmask 392448   ;;  %vm45_vm7 = vcmask 261248  }
   0x6   :  { %13 = vrot.lane.b32.xlu0 %v54_v2, %s69_s18  ;;  %25 = vrot.lane.b32.xlu1 %v56_v3, %s70_s19 }
   0xa   :  { %31 = vrot.lane.b32.xlu0 %v57_v5, %s71_s24  ;;  %37 = vrot.lane.b32.xlu1 %v58_v6, %s72_s25 }
   0xe   :  { %43 = vrot.lane.b32.xlu0 %v59_v7, %s73_s0 }
  0x74   :  { %v8_v8 = vpop.permute.xlu0 %7   ;;  %v20_v9 = vpop.permute.xlu1 %19  }
  0x75   :  { %10 = vst.msk [vmem:[#allocation0] sm:$0x1] %vm9_vm1, %v8_v8  }
  0x78   :  { %v14_v10 = vpop.permute.xlu0 %13   ;;  %v26_v11 = vpop.permute.xlu1 %25  }
  0x79   :  { %16 = vst.msk [vmem:[#allocation0] sm:$0x1] %vm15_vm2, %v14_v10  }
  0x7a   :  { %22 = vst.msk [vmem:[#allocation0] sm:$0x1] %vm21_vm3, %v20_v9  }
  0x7b   :  { %28 = vst.msk [vmem:[#allocation0] sm:$0x1] %vm27_vm4, %v26_v11  }
  0x7c   :  { %v32_v12 = vpop.permute.xlu0 %31   ;;  %v38_v13 = vpop.permute.xlu1 %37  }
  0x7d   :  { %34 = vst.msk [vmem:[#allocation0] sm:$0x1] %vm33_vm5, %v32_v12  }
  0x7e   :  { %40 = vst.msk [vmem:[#allocation0] sm:$0x1] %vm39_vm6, %v38_v13  }
  0x80   :  { %v44_v14 = vpop.permute.xlu0 %43  }
  0x81   :  { %46 = vst.msk [vmem:[#allocation0] sm:$0x1] %vm45_vm7, %v44_v14  }
  0x88   :  { %v50_v15 = vld [vmem:[#allocation0] sm:$0x1] }
  0x89   :  { %52 = vst [vmem:[%s112_s1] sm:$0x1] %v50_v15 }

// kernel: vmamba_layer_up_forward.2
= control target key start
LH: loop header
LB: loop body
LE: loop exit
PB: predicated region body
PF: predicated region fallthrough
CT: control target
= control target key end

     0   :  { %12 = vsyncpa [#allocation3], 0  ;;  %s1575_s0 = inlined_call_operand.hbm [shape: f32[128,32], index: 0, kind: input, shape index: {}]   ;;  %s1576_s1 = inlined_call_operand.hbm [shape: f32[32,128], index: 1, kind: input, shape index: {}]   ;;  %s1577_s2 = inlined_call_operand.vmem [shape: f32[32,8], index: 2, kind: input, shape index: {}]   ;;  %s1578_s3 = inlined_call_operand.vmem [shape: f32[8,128], index: 3, kind: input, shape index: {}]   ;;  %s1579_s4 = inlined_call_operand.vmem [shape: f32[128,8], index: 4, kind: input, shape index: {}]   ;;  %s1580_s5 = inlined_call_operand.vmem [shape: f32[1,128], index: 5, kind: input, shape index: {}]   ;;  %s1581_s6 = inlined_call_operand.vmem [shape: f32[1,128], index: 6, kind: input, shape index: {}]   ;;  %s1582_s7 = inlined_call_operand.vmem [shape: f32[128,128], index: 7, kind: output, shape index: {}]  }
   0x1   :  { %14 = vsyncpa [#allocation3 + $0x1], 0 }
   0x2   :  { %15 = vsyncpa [#allocation5], 0  ;;  %s1339_s24 = smov 0   ;;  %s1341_s25 = smov 0  }
   0x3   :  { %s1343_s26 = smov 0   ;;  %s1345_s27 = smov 0  }
   0x4 LB: > { %s927_s28 = sadd.s32 4294967295, %s1293_s27   ;;  %p41_p0 = scmp.ne.s32.totalorder %s1285_s25, %s1281_s24  ;;  %s1293_s27 = sphi %s1345_s27, %s1598_s27   ;;  %s1289_s26 = sphi %s1343_s26, %s1597_s26   ;;  %s1285_s25 = sphi %s1341_s25, %s1596_s25   ;;  %s1281_s24 = sphi %s1339_s24, %s1595_s24  }
   0x5   : > { %p1361_p1 = scmp.eq.s32.totalorder %s927_s28, 0  ;;  %p929_p2 = scmp.ge.s32.totalorder %s1293_s27, 1 }
   0x6   : > { %p204_p3 = scmp.lt.s32.totalorder %s1293_s27, 5  ;;  %s1295_s9 = smov [#allocation4]  }
   0x7   : > { %s1587_s29 = scalar_select %p1361_p1, 1, 0 }
   0x8   : > { %p1369_p4 = por %p1361_p1, %p41_p0  ;;  %p1373_p5 = pnand %p929_p2, %p204_p3 }
   0x9   : > { %s216_s10 = sshll.u32 %s1295_s9, 4  ;;  %s1386_s12 = sadd.s32 1, %s1293_s27   ;;  %s217_s10 = int_to_ptr.vmem [resolvable:$true] %s216_s10 }
   0xa   : > { %s1588_s30 = scalar_select %p1369_p4, 1, 0 }
   0xb   : > { %s1589_s8 = scalar_select %p1373_p5, 1, 0 }
   0xc   : > { %p1143_p6 = pneg %p1373_p5  ;;  %s28_s13 = sadd.s32 1, %s1289_s26 }
   0xd   : > { %s25_s14 = ssub.s32 %s1293_s27, %s1386_s12  ;;  %s1197_s17 = scalar_lea.hbm %s1576_s1, 512 }
   0xe   : > { %p1381_p7 = pnand %p1143_p6, %p1361_p1  ;;  %p1198_p8 = scmp.ne.s32.totalorder %s1576_s1, %s1197_s17 }
   0xf   : > { %p1204_p12 = scmp.lt.u32.totalorder %s1197_s17, %s1576_s1 }
  0x10   : > { %p1199_p9 = pneg %p1381_p7 }
  0x12   : > { %p1200_p10 = pnand %p1199_p9, %p1198_p8 }
  0x14   : > { %p1201_p11 = pneg %p1200_p10 }
  0x16   : > { %p1206_p13 = pnand %p1204_p12, %p1201_p11 }
  0x18   : > { %1209 = shalt.err (!%p1206_p13)
}
  0x19   : > { %s1210_s22 = scalar_lea.vmem %s217_s10, 512  ;;  %p1218_p6 = scmp.lt.s32.totalorder %s217_s10, %s217_s10 }
  0x1a   : > { %p1211_p0 = scmp.ne.s32.totalorder %s217_s10, %s1210_s22  ;;  %p1219_p1 = scmp.lt.s32.totalorder %s1210_s22, %s1210_s22 }
  0x1c   : > { %p1213_p2 = pnand %p1211_p0, %p1199_p9  ;;  %p1220_p4 = por %p1219_p1, %p1218_p6 }
  0x1e   : > { %p1214_p3 = pneg %p1213_p2 }
  0x20   : > { %p1221_p5 = pnand %p1220_p4, %p1214_p3 }
  0x22   : > { %1224 = shalt.err (!%p1221_p5)
}
  0x23   : > { %s1296_s23 = smov 128   ;;  %s1297_s24 = smov 8  }
  0x24   : > { %1146 = dma.hbm_to_vmem [thread:$0]  (!%p1381_p7), %s1576_s1, 512, %s217_s10, [#allocation5], %s1296_s23, %s1296_s23, %s1297_s24  }
  0x25   : > { %p26_p1 = scmp.eq.s32.totalorder %s25_s14, 0  ;;  %p35_p4 = scmp.ne.s32.totalorder %s1289_s26, %s1285_s25 }
  0x26   : > { %p36_p5 = scmp.eq.s32.totalorder %s1293_s27, 0  ;;  %p1152_p8 = scmp.lt.s32.totalorder %s1293_s27, 4 }
  0x27   : > { %s1415_s16 = scalar_select %p26_p1, %s1289_s26, %s28_s13  }
  0x28   : > { %p37_p9 = por %p36_p5, %p35_p4  ;;  %s245_s17 = sand.u32 1, %s1289_s26  }
  0x29   : > { %s932_s18 = sshll.u32 %s245_s17, 5  ;;  %s960_s19 = sshll.u32 %s1293_s27, 9 }
  0x2a   : > { %s1422_s11 = scalar_lea.hbm %s1575_s0, %s960_s19  ;;  %s249_s10 = scalar_lea.vmem [#allocation2], %s932_s18 }
  0x2b   : > { %s256_s14 = sshll.u32 %s249_s10, 4  ;;  %p1426_p7 = pnand %p1152_p8, %p37_p9  ;;  %s1424_s14 = int_to_ptr.vmem [resolvable:$true] %s256_s14 }
  0x2c   : > { %s1430_s22 = scalar_lea.sflag [#allocation3], %s245_s17  ;;  %s1225_s9 = scalar_lea.hbm %s1422_s11, 512 }
  0x2d   : > { %p1226_p10 = scmp.ne.s32.totalorder %s1422_s11, %s1225_s9  ;;  %p1227_p11 = pneg %p1426_p7 }
  0x2e   : > { %s1230_s19 = scalar_lea.hbm %s1575_s0, 2048  ;;  %p1231_p0 = scmp.lt.u32.totalorder %s1422_s11, %s1575_s0 }
  0x2f   : > { %p1228_p12 = pnand %p1227_p11, %p1226_p10  ;;  %p1232_p2 = scmp.lt.u32.totalorder %s1230_s19, %s1225_s9 }
  0x30   : > { %p1234_p6 = scmp.lt.u32.totalorder %s1225_s9, %s1422_s11 }
  0x31   : > { %p1229_p13 = pneg %p1228_p12  ;;  %p1233_p3 = por %p1232_p2, %p1231_p0 }
  0x33   : > { %p1235_p1 = por %p1234_p6, %p1233_p3 }
  0x35   : > { %p1236_p4 = pnand %p1235_p1, %p1229_p13 }
  0x37   : > { %1239 = shalt.err (!%p1236_p4)
}
  0x38   : > { %s1240_s17 = scalar_lea.vmem %s1424_s14, 512  ;;  %s1298_s10 = smov [#allocation2]  }
  0x39   : > { %p1241_p5 = scmp.ne.s32.totalorder %s1424_s14, %s1240_s17  ;;  %s1245_s15 = sshll.u32 %s1298_s10, 4  ;;  %s1246_s15 = int_to_ptr.vmem [resolvable:$false] %s1245_s15 }
  0x3a   : > { %s1247_s18 = scalar_lea.vmem %s1246_s15, 1024  ;;  %p1248_p10 = scmp.lt.s32.totalorder %s1424_s14, %s1246_s15 }
  0x3b   : > { %p1243_p8 = pnand %p1241_p5, %p1227_p11  ;;  %p1249_p12 = scmp.lt.s32.totalorder %s1247_s18, %s1240_s17 }
  0x3d   : > { %p1244_p9 = pneg %p1243_p8  ;;  %p1250_p0 = por %p1249_p12, %p1248_p10 }
  0x3f   : > { %p1251_p2 = pnand %p1250_p0, %p1244_p9 }
  0x41   : > { %1254 = shalt.err (!%p1251_p2)
}
  0x42   : > { %1150 = dma.hbm_to_vmem [thread:$0]  (!%p1426_p7), %s1422_s11, 512, %s1424_s14, %s1430_s22, %s1296_s23, %s1296_s23, %s1297_s24  }
  0x43   : > { %p1592_p11 = scmp.ne.s32.totalorder %s1589_s8, 0 }
  0x44   : > { %s270_s9 = sand.u32 (!%p1592_p11), 1, %s1285_s25   ;;  %p1593_p13 = scmp.ne.s32.totalorder (!%p1592_p11), %s1588_s30, 0 }
  0x45   : > { %268 = sbr.rel (%p1592_p11) target bundleno = 982 (0x3d6), region = 48  ;;  %s936_s19 = sshll.u32 (!%p1592_p11), %s270_s9, 5 }
  0x46   : > { %s271_s20 = scalar_lea.sflag (!%p1592_p11), [#allocation3], %s270_s9  ;;  %s274_s21 = scalar_lea.vmem (!%p1592_p11), [#allocation2], %s936_s19 }
  0x4c   : > { %1272 = dma.done.wait (%p1593_p13), %s271_s20, 512  }
  0x4d   : > { %1274 = vsyncadd (%p1593_p13), %s271_s20, 4294966784  ;;  %p1594_p3 = scmp.ne.s32.totalorder %s1587_s29, 0 }
  0x4f   : > { %1276 = dma.done.wait (%p1594_p3), [#allocation5], 512  }
  0x50   : > { %1278 = vsyncadd (%p1594_p3), [#allocation5], 4294966784  ;;  %vm324_vm0 = vcmask 261120   ;;  %v320_v0 = vld [vmem:[#allocation4] sm:$0xff]  ;;  %v321_v1 = vld [vmem:[#allocation4 + $0x8] sm:$0xff]  ;;  %vm512_vm1 = vcmask 64512  }
  0x51   : > { %v322_v2 = vld [vmem:[#allocation4 + $0x10] sm:$0xff]  ;;  %v1089_v3 = vpack.c.bf16 %v321_v1, %v320_v0  ;;  %v323_v4 = vld [vmem:[#allocation4 + $0x18] sm:$0xff]  ;;  %v316_v5 = vld [vmem:[%s274_s21] sm:$0xff]  ;;  %s938_s22 = sshll.u32 %s927_s28, 2 }
  0x52   : > { %v1093_v6 = vpack.c.bf16 %v323_v4, %v322_v2  ;;  %1015 = vmatprep.mubr.msk.f32.mxu0 %vm324_vm0, %v316_v5  ;;  %v422_v7 = vld [vmem:[%s1577_s2] sm:$0xff]  ;;  %v423_v8 = vld [vmem:[%s1577_s2 + $0x8] sm:$0xff]  ;;  %v424_v10 = vld [vmem:[%s1577_s2 + $0x10] sm:$0xff]  ;;  %p311_p7 = scmp.lt.s32.totalorder %s938_s22, 15 }
  0x53   : > { %1090 = vmatprep.subr.bf16.mxu0 %v1089_v3  ;;  %v1097_v9 = vpack.c.bf16 %v423_v8, %v422_v7  ;;  %v425_v11 = vld [vmem:[%s1577_s2 + $0x18] sm:$0xff]  ;;  %v317_v12 = vld [vmem:[%s274_s21 + $0x8] sm:$0xff]  ;;  %v318_v13 = vld [vmem:[%s274_s21 + $0x10] sm:$0xff] }
  0x54   : > { %1092 = vmatpush3.bf16.msra.mxu0 %v1089_v3  ;;  %v1101_v14 = vpack.c.bf16 %v425_v11, %v424_v10  ;;  %v319_v15 = vld [vmem:[%s274_s21 + $0x18] sm:$0xff]  ;;  %v511_v16 = vld [vmem:[%s1578_s3] sm:$0xff]  ;;  %v619_v18 = vld [vmem:[%s1579_s4 + $0x8] sm:$0xff]  ;;  %s1600_s22 = smov (!%p311_p7, %s938_s22), 15 }
  0x55   : > { %1094 = vmatprep.subr.bf16.mxu0 %v1093_v6  ;;  %v618_v17 = vld [vmem:[%s1579_s4] sm:$0xff]  ;;  %v620_v19 = vld [vmem:[%s1579_s4 + $0x10] sm:$0xff]  ;;  %v621_v21 = vld [vmem:[%s1579_s4 + $0x18] sm:$0xff]  ;;  %s939_s15 = sshll.u32 %s1600_s22, 3 }
  0x56   : > { %v1105_v20 = vpack.c.bf16 %v619_v18, %v618_v17  ;;  %v1109_v22 = vpack.c.bf16 %v621_v21, %v620_v19  ;;  %v622_v23 = vld [vmem:[%s1579_s4 + $0x20] sm:$0xff]  ;;  %v623_v24 = vld [vmem:[%s1579_s4 + $0x28] sm:$0xff]  ;;  %v624_v26 = vld [vmem:[%s1579_s4 + $0x30] sm:$0xff]  ;;  %s314_s27 = scalar_lea.vmem %s1582_s7, %s939_s15 }
  0x57   : > { %v1113_v25 = vpack.c.bf16 %v623_v24, %v622_v23  ;;  %v625_v27 = vld [vmem:[%s1579_s4 + $0x38] sm:$0xff]  ;;  %v626_v29 = vld [vmem:[%s1579_s4 + $0x40] sm:$0xff]  ;;  %v627_v30 = vld [vmem:[%s1579_s4 + $0x48] sm:$0xff] }
  0x58   : > { %1096 = vmatpush3.bf16.msra.mxu0 %v1093_v6  ;;  %1106 = vmatprep.subr.bf16.mxu1 %v1105_v20  ;;  %v1117_v28 = vpack.c.bf16 %v625_v27, %v624_v26  ;;  %v1121_v31 = vpack.c.bf16 %v627_v30, %v626_v29  ;;  %v628_v32 = vld [vmem:[%s1579_s4 + $0x50] sm:$0xff]  ;;  %v629_v33 = vld [vmem:[%s1579_s4 + $0x58] sm:$0xff]  ;;  %v630_v35 = vld [vmem:[%s1579_s4 + $0x60] sm:$0xff] }
  0x59   : > { %1098 = vmatprep.subr.bf16.mxu0 %v1097_v9  ;;  %1108 = vmatpush3.bf16.msra.mxu1 %v1105_v20  ;;  %v1125_v34 = vpack.c.bf16 %v629_v33, %v628_v32  ;;  %v631_v36 = vld [vmem:[%s1579_s4 + $0x68] sm:$0xff]  ;;  %v632_v46 = vld [vmem:[%s1579_s4 + $0x70] sm:$0xff]  ;;  %v633_v47 = vld [vmem:[%s1579_s4 + $0x78] sm:$0xff] }
  0x5a   : > { %1110 = vmatprep.subr.bf16.mxu1 %v1109_v22  ;;  %v1129_v37 = vpack.c.bf16 %v631_v36, %v630_v35  ;;  %v1133_v48 = vpack.c.bf16 %v633_v47, %v632_v46  ;;  %v956_v10 = vld [vmem:[%s1580_s5] ss:$0 sm:$0xff] }
  0x5b   : > { %1016 = vmatmul.mubr.msk.f32.vlgmr.msra.gmra.mrb[0].mxu0 %vm324_vm0, %v317_v12 }
  0x5c   : > { %1100 = vmatpush3.bf16.msra.mxu0 %v1097_v9  ;;  %1018 = vmatprep.mubr.msk.f32.mxu0 %vm324_vm0, %v318_v13 }
  0x5d   : > { %1102 = vmatprep.subr.bf16.mxu0 %v1101_v14  ;;  %1112 = vmatpush3.bf16.msra.mxu1 %v1109_v22 }
  0x5e   : > { %1114 = vmatprep.subr.bf16.mxu1 %v1113_v25 }
  0x5f   : > { %1019 = vmatmul.mubr.msk.f32.gmra.mrb[2].mxu0 %vm324_vm0, %v319_v15 }
  0x60   : > { %1104 = vmatpush3.bf16.msra.mxu0 %v1101_v14  ;;  %1029 = vmatprep.mubr.msk.f32.mxu0 %vm324_vm0, %v316_v5 }
  0x61   : > { %1035 = vmatprep.subr.mxu0 %v511_v16  ;;  %1116 = vmatpush3.bf16.msra.mxu1 %v1113_v25 }
  0x62   : > { %1118 = vmatprep.subr.bf16.mxu1 %v1117_v28 }
  0x63   : > { %1030 = vmatmul.mubr.msk.f32.vlgmr.msra.gmra.mrb[4].mxu0 %vm324_vm0, %v317_v12 }
  0x64   : > { %1032 = vmatprep.mubr.msk.f32.mxu0 %vm324_vm0, %v318_v13  ;;  %1036 = vmatpush3.msra.mxu0 %v511_v16  ;;  %v957_v13 = vld [vmem:[%s1581_s6] ss:$0 sm:$0xff] }
  0x65   : > { %1081 = vmatprep.subr.mxu0 %v511_v16  ;;  %1120 = vmatpush3.bf16.msra.mxu1 %v1117_v28 }
  0x66   : > { %1122 = vmatprep.subr.bf16.mxu1 %v1121_v31 }
  0x67   : > { %1033 = vmatmul.mubr.msk.f32.gmra.mrb[6].mxu0 %vm324_vm0, %v319_v15 }
  0x69   : > { %1124 = vmatpush3.bf16.msra.mxu1 %v1121_v31 }
  0x6a   : > { %1126 = vmatprep.subr.bf16.mxu1 %v1125_v34 }
  0x6d   : > { %1128 = vmatpush3.bf16.msra.mxu1 %v1125_v34 }
  0x6e   : > { %1130 = vmatprep.subr.bf16.mxu1 %v1129_v37 }
  0x71   : > { %1132 = vmatpush3.bf16.msra.mxu1 %v1129_v37 }
  0x72   : > { %1134 = vmatprep.subr.bf16.mxu1 %v1133_v48 }
  0x75   : > { %1136 = vmatpush3.bf16.msra.mxu1 %v1133_v48 }
 0x12e   : > { %v1017_v38 = vpop.f32.mrb[0].mxu0 }
 0x12f   : > { %v403_v39 = vpop.f32.mrb[1].mxu0 }
 0x132   : > { %v1020_v40 = vpop.f32.mrb[2].mxu0 }
 0x133   : > { %v413_v41 = vpop.f32.mrb[3].mxu0 }
 0x136   : > { %v1031_v42 = vpop.f32.mrb[4].mxu0 }
 0x137   : > { %v492_v43 = vpop.f32.mrb[5].mxu0 }
 0x138   : > { %1037 = vmatprep.mubr.msk.f32.mxu0 %vm512_vm1, %v492_v43 }
 0x139   : > { %1038 = vmatmul.mubr.msk.f32.vlgmr.msra.gmra.mrb[8].mxu0 %vm512_vm1, %v1031_v42 }
 0x13a   : > { %v1034_v44 = vpop.f32.mrb[6].mxu0  ;;  %1082 = vmatpush3.msra.mxu0 %v511_v16 }
 0x13b   : > { %v502_v45 = vpop.f32.mrb[7].mxu0 }
 0x13c   : > { %1040 = vmatprep.mubr.msk.f32.mxu0 %vm512_vm1, %v502_v45 }
 0x13d   : > { %1041 = vmatmul.mubr.msk.f32.gmra.mrb[10].mxu0 %vm512_vm1, %v1034_v44 }
 0x20c   : > { %v1039_v49 = vpop.f32.mrb[8].mxu0 }
 0x20d   : > { %v611_v50 = vsub.f32 %v1017_v38, %v1039_v49  ;;  %v591_v51 = vpop.f32.mrb[9].mxu0 }
 0x20e   : > { %v610_v52 = vsub.f32 %v403_v39, %v591_v51 }
 0x20f   : > { %v615_v55 = vmul.f32 %v611_v50, %v611_v50 }
 0x210   : > { %v1042_v53 = vpop.f32.mrb[10].mxu0  ;;  %v614_v54 = vmul.f32 %v610_v52, %v610_v52 }
 0x211   : > { %v613_v56 = vsub.f32 %v1020_v40, %v1042_v53  ;;  %v601_v57 = vpop.f32.mrb[11].mxu0 }
 0x212   : > { %v612_v58 = vsub.f32 %v413_v41, %v601_v57  ;;  %1075 = vmatprep.mubr.f32.mxu1 %v614_v54 }
 0x213   : > { %1076 = vmatmul.mubr.f32.vlgmr.msra.gmra.mrb[0].mxu1 %v615_v55  ;;  %v617_v60 = vmul.f32 %v613_v56, %v613_v56 }
 0x214   : > { %v616_v59 = vmul.f32 %v612_v58, %v612_v58 }
 0x216   : > { %1078 = vmatprep.mubr.f32.mxu1 %v616_v59 }
 0x217   : > { %1079 = vmatmul.mubr.f32.gmra.mrb[2].mxu1 %v617_v60 }
 0x2e6   : > { %v1077_v61 = vpop.f32.mrb[0].mxu1 }
 0x2e7   : > { %v706_v62 = vadd.f32 1e-05, %v1077_v61  ;;  %v700_v63 = vpop.f32.mrb[1].mxu1 }
 0x2e8   : > { %v701_v0 = vadd.f32 1e-05, %v700_v63 }
 0x2ea   : > { %1189 = vrsqrt.f32 %v701_v0  ;;  %v1080_v1 = vpop.f32.mrb[2].mxu1 }
 0x2eb   : > { %1191 = vrsqrt.f32 %v706_v62  ;;  %v716_v2 = vadd.f32 1e-05, %v1080_v1  ;;  %v710_v3 = vpop.f32.mrb[3].mxu1 }
 0x2ec   : > { %v711_v4 = vadd.f32 1e-05, %v710_v3 }
 0x2ee   : > { %1193 = vrsqrt.f32 %v711_v4 }
 0x2ef   : > { %1195 = vrsqrt.f32 %v716_v2 }
 0x2f4   : > { %v1190_v5 = vpop.eup %1189 }
 0x2f5   : > { %v1192_v6 = vpop.eup %1191  ;;  %1083 = vmatprep.mubr.msk.f32.mxu0 %vm512_vm1, %v1190_v5 }
 0x2f6   : > { %1084 = vmatmul.mubr.msk.f32.vlgmr.msra.gmra.mrb[12].mxu0 %vm512_vm1, %v1192_v6 }
 0x2f8   : > { %v1194_v7 = vpop.eup %1193 }
 0x2f9   : > { %v1196_v8 = vpop.eup %1195  ;;  %1086 = vmatprep.mubr.msk.f32.mxu0 %vm512_vm1, %v1194_v7 }
 0x2fa   : > { %1087 = vmatmul.mubr.msk.f32.gmra.mrb[14].mxu0 %vm512_vm1, %v1196_v8 }
 0x3c9   : > { %v1085_v9 = vpop.f32.mrb[12].mxu0 }
 0x3ca   : > { %v821_v11 = vmul.f32 %v1085_v9, %v611_v50  ;;  %v801_v12 = vpop.f32.mrb[13].mxu0 }
 0x3cb   : > { %v820_v14 = vmul.f32 %v801_v12, %v610_v52 }
 0x3cc   : > { %v832_v15 = vmul.f32 %v956_v10, %v821_v11 }
 0x3cd   : > { %v831_v16 = vmul.f32 %v956_v10, %v820_v14  ;;  %v1088_v17 = vpop.f32.mrb[14].mxu0 }
 0x3ce   : > { %v843_v18 = vadd.f32 %v957_v13, %v832_v15  ;;  %v823_v19 = vmul.f32 %v1088_v17, %v613_v56  ;;  %v811_v20 = vpop.f32.mrb[15].mxu0 }
 0x3cf   : > { %v842_v21 = vadd.f32 %v957_v13, %v831_v16  ;;  %v822_v22 = vmul.f32 %v811_v20, %v612_v58 }
 0x3d0   : > { %847 = vst [vmem:[%s314_s27 + $0x8] sm:$0xff] %v843_v18  ;;  %v834_v23 = vmul.f32 %v956_v10, %v823_v19 }
 0x3d1   : > { %846 = vst [vmem:[%s314_s27] sm:$0xff] %v842_v21  ;;  %v833_v24 = vmul.f32 %v956_v10, %v822_v22 }
 0x3d2   : > { %v845_v25 = vadd.f32 %v957_v13, %v834_v23 }
 0x3d3   : > { %v844_v26 = vadd.f32 %v957_v13, %v833_v24 }
 0x3d4   : > { %849 = vst [vmem:[%s314_s27 + $0x18] sm:$0xff] %v845_v25 }
 0x3d5   : > { %848 = vst [vmem:[%s314_s27 + $0x10] sm:$0xff] %v844_v26 }
 0x3d6 PF: > { %p18_p6 = scmp.ge.s32.totalorder %s1386_s12, 6   ;;  %s1595_s24 = smov %s1285_s25 }
 0x3d7   : > { %s1596_s25 = smov %s1289_s26  ;;  %s1597_s26 = smov %s1415_s16 }
 0x3d8   : > { %s1598_s27 = smov %s1386_s12  ;;  %20 = sbr.rel (!%p18_p6) target bundleno = 4 (0x4), region = 92 }
 0x3df   :  { %872 = vsyncpa [#allocation3], 1 }
 0x3e0   :  { %874 = vsyncpa [#allocation3 + $0x1], 1 }
 0x3e1   :  { %875 = vsyncpa [#allocation5], 1 }

// kernel: tile.28
= control target key start
LH: loop header
LB: loop body
LE: loop exit
PB: predicated region body
PF: predicated region fallthrough
CT: control target
= control target key end

     0   :  { %s28_s0 = inlined_call_operand.vmem [shape: f32[16], index: 0, kind: input, shape index: {}]   ;;  %s29_s1 = inlined_call_operand.vmem [shape: f32[16,16], index: 1, kind: output, shape index: {}]  }
   0x1   :  { %v4_v0 = vld [vmem:[%s28_s0] ss:$0 sm:$0xff] }
   0x2   :  { %5 = vst [vmem:[%s29_s1] sm:$0xff] %v4_v0  ;;  %8 = vst [vmem:[%s29_s1 + $0x8] sm:$0xff] %v4_v0 }

// kernel: tile.29
= control target key start
LH: loop header
LB: loop body
LE: loop exit
PB: predicated region body
PF: predicated region fallthrough
CT: control target
= control target key end

     0   :  { %s7_s6 = smov 3  ;;  %s21_s9 = smov 3  ;;  %vm4_vm0 = vcmask 130048   ;;  %vm11_vm1 = vcmask 1048448   ;;  %vm18_vm2 = vcmask 917248   ;;  %vm25_vm3 = vcmask 786048   ;;  %s128_s0 = inlined_call_operand.vmem [shape: f32[16,16], index: 0, kind: input, shape index: {}]   ;;  %s129_s1 = inlined_call_operand.vmem [shape: f32[1,256], index: 1, kind: output, shape index: {}]  }
   0x1   :  { %v66_v0 = vld [vmem:[%s128_s0 + $0x7] ss:$8 sm:%s7_s6]   ;;  %s81_s10 = smov 112   ;;  %v68_v1 = vld [vmem:[%s128_s0 + $0x5] ss:$8 sm:%s21_s9]   ;;  %s14_s13 = smov 3 }
   0x2   :  { %9 = vrot.lane.b32.xlu0 %v66_v0, %s81_s10  ;;  %s82_s14 = smov 80   ;;  %v67_v2 = vld [vmem:[%s128_s0 + $0x6] ss:$8 sm:%s14_s13]   ;;  %s28_s17 = smov 3  ;;  %vm32_vm4 = vcmask 654848   ;;  %vm39_vm5 = vcmask 523648  }
   0x3   :  { %23 = vrot.lane.b32.xlu1 %v68_v1, %s82_s14  ;;  %v69_v3 = vld [vmem:[%s128_s0 + $0x4] ss:$8 sm:%s28_s17]   ;;  %s35_s20 = smov 3  ;;  %s42_s21 = smov 3  ;;  %vm46_vm6 = vcmask 392448   ;;  %vm53_vm7 = vcmask 261248  }
   0x4   :  { %s83_s22 = smov 96   ;;  %s84_s23 = smov 64   ;;  %v70_v4 = vld [vmem:[%s128_s0 + $0x3] ss:$8 sm:%s35_s20]   ;;  %v71_v5 = vld [vmem:[%s128_s0 + $0x2] ss:$8 sm:%s42_s21]  }
   0x5   :  { %s2_s26 = smov 3  ;;  %s49_s29 = smov 3 }
   0x6   :  { %16 = vrot.lane.b32.xlu0 %v67_v2, %s83_s22  ;;  %v3_v6 = vld [vmem:[%s128_s0] ss:$8 sm:%s2_s26]   ;;  %s85_s3 = smov 48   ;;  %s86_s4 = smov 32  }
   0x7   :  { %30 = vrot.lane.b32.xlu1 %v69_v3, %s84_s23  ;;  %5 = vst.msk [vmem:[#allocation0] ss:$8 sm:$0x3] %vm4_vm0, %v3_v6   ;;  %v72_v7 = vld [vmem:[%s128_s0 + $0x1] ss:$8 sm:%s49_s29]   ;;  %s87_s0 = smov 16  }
   0xa   :  { %37 = vrot.lane.b32.xlu0 %v70_v4, %s85_s3 }
   0xb   :  { %44 = vrot.lane.b32.xlu1 %v71_v5, %s86_s4 }
   0xe   :  { %51 = vrot.lane.b32.xlu0 %v72_v7, %s87_s0 }
  0x74   :  { %v10_v8 = vpop.permute.xlu0 %9  }
  0x75   :  { %12 = vst.msk [vmem:[#allocation0] ss:$8 sm:$0x3] %vm11_vm1, %v10_v8   ;;  %v24_v9 = vpop.permute.xlu1 %23  }
  0x78   :  { %v17_v10 = vpop.permute.xlu0 %16  }
  0x79   :  { %19 = vst.msk [vmem:[#allocation0] ss:$8 sm:$0x3] %vm18_vm2, %v17_v10   ;;  %v31_v11 = vpop.permute.xlu1 %30  }
  0x7a   :  { %26 = vst.msk [vmem:[#allocation0] ss:$8 sm:$0x3] %vm25_vm3, %v24_v9  }
  0x7b   :  { %33 = vst.msk [vmem:[#allocation0] ss:$8 sm:$0x3] %vm32_vm4, %v31_v11  }
  0x7c   :  { %v38_v12 = vpop.permute.xlu0 %37  }
  0x7d   :  { %40 = vst.msk [vmem:[#allocation0] ss:$8 sm:$0x3] %vm39_vm5, %v38_v12   ;;  %v45_v13 = vpop.permute.xlu1 %44  }
  0x7e   :  { %47 = vst.msk [vmem:[#allocation0] ss:$8 sm:$0x3] %vm46_vm6, %v45_v13  }
  0x80   :  { %v52_v14 = vpop.permute.xlu0 %51  }
  0x81   :  { %54 = vst.msk [vmem:[#allocation0] ss:$8 sm:$0x3] %vm53_vm7, %v52_v14  }
  0x88   :  { %v58_v15 = vld [vmem:[#allocation0] sm:$0x1]  ;;  %v62_v16 = vld [vmem:[#allocation0 + $0x8] sm:$0x1] }
  0x89   :  { %60 = vst [vmem:[%s129_s1] sm:$0x1] %v58_v15  ;;  %73 = vst [vmem:[%s129_s1 + $0x1] sm:$0x1] %v62_v16 }

// kernel: vmamba_layer_up_forward.3
= control target key start
LH: loop header
LB: loop body
LE: loop exit
PB: predicated region body
PF: predicated region fallthrough
CT: control target
= control target key end

     0   :  { %s835_s18 = smov 0   ;;  %s1262_s0 = inlined_call_operand.vmem [shape: f32[64,256], index: 0, kind: input, shape index: {}]   ;;  %s1263_s1 = inlined_call_operand.vmem [shape: f32[64,256], index: 1, kind: input, shape index: {}]   ;;  %s1264_s2 = inlined_call_operand.vmem [shape: f32[256,256], index: 2, kind: input, shape index: {}]   ;;  %s1265_s3 = inlined_call_operand.vmem [shape: f32[256,256], index: 3, kind: input, shape index: {}]   ;;  %s1266_s4 = inlined_call_operand.vmem [shape: f32[1,256], index: 4, kind: input, shape index: {}]   ;;  %s1267_s5 = inlined_call_operand.vmem [shape: f32[64,256], index: 5, kind: output, shape index: {}]  }
   0x1 LB: > { %s638_s19 = sadd.s32 4294967295, %s803_s18   ;;  %p642_p0 = scmp.ge.s32.totalorder %s803_s18, 1  ;;  %s803_s18 = sphi %s835_s18, %s15_s18  }
   0x2   : > { %p201_p1 = scmp.lt.s32.totalorder %s803_s18, 5 }
   0x4   : > { %p202_p2 = pnand %p642_p0, %p201_p1 }
   0x5   : > { %v331_v0 = vld [vmem:[%s1265_s3 + $0x8] sm:$0xff] (!%p202_p2)  ;;  %v333_v1 = vld [vmem:[%s1265_s3 + $0x18] sm:$0xff] (!%p202_p2)  ;;  %v330_v5 = vld [vmem:[%s1265_s3] sm:$0xff] (!%p202_p2)  ;;  %s643_s6 = sshll.u32 (!%p202_p2), %s638_s19, 1 }
   0x6   : > { %205 = sbr.rel (%p202_p2) target bundleno = 295 (0x127), region = 40  ;;  %v263_v2 = vld [vmem:[%s1264_s2 + $0x8] sm:$0xff] (!%p202_p2)  ;;  %v657_v3 = vpack.c.bf16 (!%p202_p2), %v333_v1, %v331_v0  ;;  %v265_v4 = vld [vmem:[%s1264_s2 + $0x18] sm:$0xff] (!%p202_p2)  ;;  %v332_v6 = vld [vmem:[%s1265_s3 + $0x10] sm:$0xff] (!%p202_p2)  ;;  %p238_p3 = scmp.lt.s32.totalorder (!%p202_p2), %s643_s6, 7 }
   0x7   : > { %v721_v7 = vpack.c.bf16 (!%p202_p2), %v265_v4, %v263_v2  ;;  %v659_v8 = vpack.c.bf16 (!%p202_p2), %v332_v6, %v330_v5  ;;  %v262_v9 = vld [vmem:[%s1264_s2] sm:$0xff] (!%p202_p2)  ;;  %v264_v10 = vld [vmem:[%s1264_s2 + $0x10] sm:$0xff] (!%p202_p2)  ;;  %v335_v11 = vld [vmem:[%s1265_s3 + $0x28] sm:$0xff] (!%p202_p2) }
   0x8   : > { %658 = vmatprep.subr.bf16.mxu1 (!%p202_p2), %v657_v3  ;;  %v723_v12 = vpack.c.bf16 (!%p202_p2), %v264_v10, %v262_v9  ;;  %v337_v13 = vld [vmem:[%s1265_s3 + $0x38] sm:$0xff] (!%p202_p2)  ;;  %v267_v14 = vld [vmem:[%s1264_s2 + $0x28] sm:$0xff] (!%p202_p2)  ;;  %v334_v18 = vld [vmem:[%s1265_s3 + $0x20] sm:$0xff] (!%p202_p2) }
   0x9   : > { %v269_v15 = vld [vmem:[%s1264_s2 + $0x38] sm:$0xff] (!%p202_p2)  ;;  %722 = vmatprep.subr.bf16.mxu0 (!%p202_p2), %v721_v7  ;;  %660 = vmatpush1.bf16.msra.mxu1 (!%p202_p2), %v659_v8  ;;  %v661_v16 = vpack.c.bf16 (!%p202_p2), %v337_v13, %v335_v11  ;;  %v336_v19 = vld [vmem:[%s1265_s3 + $0x30] sm:$0xff] (!%p202_p2)  ;;  %v266_v20 = vld [vmem:[%s1264_s2 + $0x20] sm:$0xff] (!%p202_p2) }
   0xa   : > { %v725_v17 = vpack.c.bf16 (!%p202_p2), %v269_v15, %v267_v14  ;;  %724 = vmatpush1.bf16.msra.mxu0 (!%p202_p2), %v723_v12  ;;  %v663_v21 = vpack.c.bf16 (!%p202_p2), %v336_v19, %v334_v18  ;;  %v268_v22 = vld [vmem:[%s1264_s2 + $0x30] sm:$0xff] (!%p202_p2)  ;;  %v339_v23 = vld [vmem:[%s1265_s3 + $0x48] sm:$0xff] (!%p202_p2)  ;;  %v341_v24 = vld [vmem:[%s1265_s3 + $0x58] sm:$0xff] (!%p202_p2) }
   0xb   : > { %662 = vmatprep.subr.bf16.mxu1 (!%p202_p2), %v661_v16  ;;  %v727_v25 = vpack.c.bf16 (!%p202_p2), %v268_v22, %v266_v20  ;;  %v665_v26 = vpack.c.bf16 (!%p202_p2), %v341_v24, %v339_v23  ;;  %v271_v27 = vld [vmem:[%s1264_s2 + $0x48] sm:$0xff] (!%p202_p2)  ;;  %v273_v28 = vld [vmem:[%s1264_s2 + $0x58] sm:$0xff] (!%p202_p2)  ;;  %v338_v29 = vld [vmem:[%s1265_s3 + $0x40] sm:$0xff] (!%p202_p2) }
   0xc   : > { %726 = vmatprep.subr.bf16.mxu0 (!%p202_p2), %v725_v17  ;;  %v729_v30 = vpack.c.bf16 (!%p202_p2), %v273_v28, %v271_v27  ;;  %v340_v31 = vld [vmem:[%s1265_s3 + $0x50] sm:$0xff] (!%p202_p2)  ;;  %v270_v32 = vld [vmem:[%s1264_s2 + $0x40] sm:$0xff] (!%p202_p2)  ;;  %v343_v35 = vld [vmem:[%s1265_s3 + $0x68] sm:$0xff] (!%p202_p2) }
   0xd   : > { %v272_v33 = vld [vmem:[%s1264_s2 + $0x50] sm:$0xff]  ;;  %664 = vmatpush1.bf16.msra.mxu1 %v663_v21  ;;  %v667_v34 = vpack.c.bf16 %v340_v31, %v338_v29  ;;  %v345_v36 = vld [vmem:[%s1265_s3 + $0x78] sm:$0xff]  ;;  %v275_v37 = vld [vmem:[%s1264_s2 + $0x68] sm:$0xff]  ;;  %s1269_s6 = smov (!%p238_p3, %s643_s6), 7 }
   0xe   : > { %728 = vmatpush1.bf16.msra.mxu0 %v727_v25  ;;  %666 = vmatprep.subr.bf16.mxu1 %v665_v26  ;;  %v731_v38 = vpack.c.bf16 %v272_v33, %v270_v32  ;;  %v669_v39 = vpack.c.bf16 %v345_v36, %v343_v35  ;;  %v277_v40 = vld [vmem:[%s1264_s2 + $0x78] sm:$0xff]  ;;  %v342_v41 = vld [vmem:[%s1265_s3 + $0x60] sm:$0xff]  ;;  %v344_v42 = vld [vmem:[%s1265_s3 + $0x70] sm:$0xff]  ;;  %s1098_s27 = sshll.u32 %s1269_s6, 4 }
   0xf   : > { %730 = vmatprep.subr.bf16.mxu0 %v729_v30  ;;  %v733_v43 = vpack.c.bf16 %v277_v40, %v275_v37  ;;  %v274_v44 = vld [vmem:[%s1264_s2 + $0x60] sm:$0xff]  ;;  %v276_v45 = vld [vmem:[%s1264_s2 + $0x70] sm:$0xff]  ;;  %v347_v46 = vld [vmem:[%s1265_s3 + $0x88] sm:$0xff]  ;;  %v671_v50 = vpack.c.bf16 %v344_v42, %v342_v41  ;;  %s1128_s22 = scalar_lea.vmem %s1263_s1, %s1098_s27  ;;  %s1137_s28 = scalar_lea.vmem %s1262_s0, %s1098_s27 }
  0x10   : > { %v349_v47 = vld [vmem:[%s1265_s3 + $0x98] sm:$0xff]  ;;  %v279_v48 = vld [vmem:[%s1264_s2 + $0x88] sm:$0xff]  ;;  %v735_v51 = vpack.c.bf16 %v276_v45, %v274_v44  ;;  %v346_v53 = vld [vmem:[%s1265_s3 + $0x80] sm:$0xff] }
  0x11   : > { %v281_v49 = vld [vmem:[%s1264_s2 + $0x98] sm:$0xff]  ;;  %668 = vmatpush1.bf16.msra.mxu1 %v667_v34  ;;  %v673_v52 = vpack.c.bf16 %v349_v47, %v347_v46  ;;  %v348_v54 = vld [vmem:[%s1265_s3 + $0x90] sm:$0xff]  ;;  %v278_v55 = vld [vmem:[%s1264_s2 + $0x80] sm:$0xff] }
  0x12   : > { %732 = vmatpush1.bf16.msra.mxu0 %v731_v38  ;;  %670 = vmatprep.subr.bf16.mxu1 %v669_v39  ;;  %v737_v56 = vpack.c.bf16 %v281_v49, %v279_v48  ;;  %v280_v57 = vld [vmem:[%s1264_s2 + $0x90] sm:$0xff]  ;;  %v351_v58 = vld [vmem:[%s1265_s3 + $0xa8] sm:$0xff]  ;;  %v353_v59 = vld [vmem:[%s1265_s3 + $0xb8] sm:$0xff]  ;;  %v675_v62 = vpack.c.bf16 %v348_v54, %v346_v53 }
  0x13   : > { %734 = vmatprep.subr.bf16.mxu0 %v733_v43  ;;  %v283_v60 = vld [vmem:[%s1264_s2 + $0xa8] sm:$0xff]  ;;  %v285_v61 = vld [vmem:[%s1264_s2 + $0xb8] sm:$0xff]  ;;  %v739_v63 = vpack.c.bf16 %v280_v57, %v278_v55  ;;  %v677_v0 = vpack.c.bf16 %v353_v59, %v351_v58  ;;  %v350_v1 = vld [vmem:[%s1265_s3 + $0xa0] sm:$0xff] }
  0x14   : > { %v352_v2 = vld [vmem:[%s1265_s3 + $0xb0] sm:$0xff]  ;;  %v282_v3 = vld [vmem:[%s1264_s2 + $0xa0] sm:$0xff]  ;;  %v741_v4 = vpack.c.bf16 %v285_v61, %v283_v60  ;;  %v355_v6 = vld [vmem:[%s1265_s3 + $0xc8] sm:$0xff] }
  0x15   : > { %672 = vmatpush1.bf16.msra.mxu1 %v671_v50  ;;  %v284_v5 = vld [vmem:[%s1264_s2 + $0xb0] sm:$0xff]  ;;  %v357_v7 = vld [vmem:[%s1265_s3 + $0xd8] sm:$0xff]  ;;  %v287_v8 = vld [vmem:[%s1264_s2 + $0xc8] sm:$0xff]  ;;  %v679_v10 = vpack.c.bf16 %v352_v2, %v350_v1 }
  0x16   : > { %736 = vmatpush1.bf16.msra.mxu0 %v735_v51  ;;  %674 = vmatprep.subr.bf16.mxu1 %v673_v52  ;;  %v289_v9 = vld [vmem:[%s1264_s2 + $0xd8] sm:$0xff]  ;;  %v743_v11 = vpack.c.bf16 %v284_v5, %v282_v3  ;;  %v681_v12 = vpack.c.bf16 %v357_v7, %v355_v6  ;;  %v354_v13 = vld [vmem:[%s1265_s3 + $0xc0] sm:$0xff]  ;;  %v356_v14 = vld [vmem:[%s1265_s3 + $0xd0] sm:$0xff] }
  0x17   : > { %738 = vmatprep.subr.bf16.mxu0 %v737_v56  ;;  %v286_v15 = vld [vmem:[%s1264_s2 + $0xc0] sm:$0xff]  ;;  %v745_v16 = vpack.c.bf16 %v289_v9, %v287_v8  ;;  %v288_v17 = vld [vmem:[%s1264_s2 + $0xd0] sm:$0xff]  ;;  %v359_v18 = vld [vmem:[%s1265_s3 + $0xe8] sm:$0xff]  ;;  %v683_v22 = vpack.c.bf16 %v356_v14, %v354_v13 }
  0x18   : > { %v361_v19 = vld [vmem:[%s1265_s3 + $0xf8] sm:$0xff]  ;;  %v291_v20 = vld [vmem:[%s1264_s2 + $0xe8] sm:$0xff]  ;;  %v747_v23 = vpack.c.bf16 %v288_v17, %v286_v15  ;;  %v358_v25 = vld [vmem:[%s1265_s3 + $0xe0] sm:$0xff] }
  0x19   : > { %676 = vmatpush1.bf16.msra.mxu1 %v675_v62  ;;  %v293_v21 = vld [vmem:[%s1264_s2 + $0xf8] sm:$0xff]  ;;  %v685_v24 = vpack.c.bf16 %v361_v19, %v359_v18  ;;  %v360_v26 = vld [vmem:[%s1265_s3 + $0xf0] sm:$0xff]  ;;  %v290_v27 = vld [vmem:[%s1264_s2 + $0xe0] sm:$0xff] }
  0x1a   : > { %740 = vmatpush1.bf16.msra.mxu0 %v739_v63  ;;  %678 = vmatprep.subr.bf16.mxu1 %v677_v0  ;;  %v749_v28 = vpack.c.bf16 %v293_v21, %v291_v20  ;;  %v292_v29 = vld [vmem:[%s1264_s2 + $0xf0] sm:$0xff]  ;;  %v363_v30 = vld [vmem:[%s1265_s3 + $0x108] sm:$0xff]  ;;  %v365_v31 = vld [vmem:[%s1265_s3 + $0x118] sm:$0xff]  ;;  %v687_v34 = vpack.c.bf16 %v360_v26, %v358_v25 }
  0x1b   : > { %742 = vmatprep.subr.bf16.mxu0 %v741_v4  ;;  %v295_v32 = vld [vmem:[%s1264_s2 + $0x108] sm:$0xff]  ;;  %v297_v33 = vld [vmem:[%s1264_s2 + $0x118] sm:$0xff]  ;;  %v751_v35 = vpack.c.bf16 %v292_v29, %v290_v27  ;;  %v689_v36 = vpack.c.bf16 %v365_v31, %v363_v30  ;;  %v362_v37 = vld [vmem:[%s1265_s3 + $0x100] sm:$0xff] }
  0x1c   : > { %v364_v38 = vld [vmem:[%s1265_s3 + $0x110] sm:$0xff]  ;;  %v294_v39 = vld [vmem:[%s1264_s2 + $0x100] sm:$0xff]  ;;  %v753_v40 = vpack.c.bf16 %v297_v33, %v295_v32  ;;  %v367_v42 = vld [vmem:[%s1265_s3 + $0x128] sm:$0xff] }
  0x1d   : > { %680 = vmatpush1.bf16.msra.mxu1 %v679_v10  ;;  %v296_v41 = vld [vmem:[%s1264_s2 + $0x110] sm:$0xff]  ;;  %v369_v43 = vld [vmem:[%s1265_s3 + $0x138] sm:$0xff]  ;;  %v299_v44 = vld [vmem:[%s1264_s2 + $0x128] sm:$0xff]  ;;  %v691_v46 = vpack.c.bf16 %v364_v38, %v362_v37 }
  0x1e   : > { %744 = vmatpush1.bf16.msra.mxu0 %v743_v11  ;;  %682 = vmatprep.subr.bf16.mxu1 %v681_v12  ;;  %v301_v45 = vld [vmem:[%s1264_s2 + $0x138] sm:$0xff]  ;;  %v755_v47 = vpack.c.bf16 %v296_v41, %v294_v39  ;;  %v693_v48 = vpack.c.bf16 %v369_v43, %v367_v42  ;;  %v366_v49 = vld [vmem:[%s1265_s3 + $0x120] sm:$0xff]  ;;  %v368_v50 = vld [vmem:[%s1265_s3 + $0x130] sm:$0xff] }
  0x1f   : > { %746 = vmatprep.subr.bf16.mxu0 %v745_v16  ;;  %v298_v51 = vld [vmem:[%s1264_s2 + $0x120] sm:$0xff]  ;;  %v757_v52 = vpack.c.bf16 %v301_v45, %v299_v44  ;;  %v300_v53 = vld [vmem:[%s1264_s2 + $0x130] sm:$0xff]  ;;  %v371_v54 = vld [vmem:[%s1265_s3 + $0x148] sm:$0xff]  ;;  %v695_v58 = vpack.c.bf16 %v368_v50, %v366_v49 }
  0x20   : > { %v373_v55 = vld [vmem:[%s1265_s3 + $0x158] sm:$0xff]  ;;  %v303_v56 = vld [vmem:[%s1264_s2 + $0x148] sm:$0xff]  ;;  %v759_v59 = vpack.c.bf16 %v300_v53, %v298_v51  ;;  %v370_v61 = vld [vmem:[%s1265_s3 + $0x140] sm:$0xff] }
  0x21   : > { %684 = vmatpush1.bf16.msra.mxu1 %v683_v22  ;;  %v305_v57 = vld [vmem:[%s1264_s2 + $0x158] sm:$0xff]  ;;  %v697_v60 = vpack.c.bf16 %v373_v55, %v371_v54  ;;  %v372_v62 = vld [vmem:[%s1265_s3 + $0x150] sm:$0xff]  ;;  %v302_v63 = vld [vmem:[%s1264_s2 + $0x140] sm:$0xff] }
  0x22   : > { %748 = vmatpush1.bf16.msra.mxu0 %v747_v23  ;;  %686 = vmatprep.subr.bf16.mxu1 %v685_v24  ;;  %v761_v0 = vpack.c.bf16 %v305_v57, %v303_v56  ;;  %v304_v1 = vld [vmem:[%s1264_s2 + $0x150] sm:$0xff]  ;;  %v375_v2 = vld [vmem:[%s1265_s3 + $0x168] sm:$0xff]  ;;  %v377_v3 = vld [vmem:[%s1265_s3 + $0x178] sm:$0xff]  ;;  %v699_v6 = vpack.c.bf16 %v372_v62, %v370_v61 }
  0x23   : > { %750 = vmatprep.subr.bf16.mxu0 %v749_v28  ;;  %v307_v4 = vld [vmem:[%s1264_s2 + $0x168] sm:$0xff]  ;;  %v309_v5 = vld [vmem:[%s1264_s2 + $0x178] sm:$0xff]  ;;  %v374_v7 = vld [vmem:[%s1265_s3 + $0x160] sm:$0xff]  ;;  %v763_v8 = vpack.c.bf16 %v304_v1, %v302_v63  ;;  %v701_v9 = vpack.c.bf16 %v377_v3, %v375_v2 }
  0x24   : > { %v376_v10 = vld [vmem:[%s1265_s3 + $0x170] sm:$0xff]  ;;  %v306_v11 = vld [vmem:[%s1264_s2 + $0x160] sm:$0xff]  ;;  %v765_v13 = vpack.c.bf16 %v309_v5, %v307_v4  ;;  %v379_v14 = vld [vmem:[%s1265_s3 + $0x188] sm:$0xff] }
  0x25   : > { %688 = vmatpush1.bf16.msra.mxu1 %v687_v34  ;;  %v308_v12 = vld [vmem:[%s1264_s2 + $0x170] sm:$0xff]  ;;  %v381_v15 = vld [vmem:[%s1265_s3 + $0x198] sm:$0xff]  ;;  %v327_v16 = vld [vmem:[%s1128_s22 + $0x8] sm:$0xff]  ;;  %v703_v20 = vpack.c.bf16 %v376_v10, %v374_v7 }
  0x26   : > { %752 = vmatpush1.bf16.msra.mxu0 %v751_v35  ;;  %690 = vmatprep.subr.bf16.mxu1 %v689_v36  ;;  %v311_v17 = vld [vmem:[%s1264_s2 + $0x188] sm:$0xff]  ;;  %v313_v18 = vld [vmem:[%s1264_s2 + $0x198] sm:$0xff]  ;;  %v767_v21 = vpack.c.bf16 %v308_v12, %v306_v11  ;;  %v705_v22 = vpack.c.bf16 %v381_v15, %v379_v14  ;;  %v378_v23 = vld [vmem:[%s1265_s3 + $0x180] sm:$0xff] }
  0x27   : > { %754 = vmatprep.subr.bf16.mxu0 %v753_v40  ;;  %458 = vmatprep.mubr.f32.mxu1 %v327_v16  ;;  %v259_v19 = vld [vmem:[%s1137_s28 + $0x8] sm:$0xff]  ;;  %v380_v24 = vld [vmem:[%s1265_s3 + $0x190] sm:$0xff]  ;;  %v310_v25 = vld [vmem:[%s1264_s2 + $0x180] sm:$0xff]  ;;  %v769_v26 = vpack.c.bf16 %v313_v18, %v311_v17 }
  0x28   : > { %535 = vmatprep.mubr.f32.mxu0 %v259_v19  ;;  %v312_v27 = vld [vmem:[%s1264_s2 + $0x190] sm:$0xff]  ;;  %v383_v28 = vld [vmem:[%s1265_s3 + $0x1a8] sm:$0xff]  ;;  %v385_v29 = vld [vmem:[%s1265_s3 + $0x1b8] sm:$0xff]  ;;  %v707_v32 = vpack.c.bf16 %v380_v24, %v378_v23 }
  0x29   : > { %692 = vmatpush1.bf16.msra.mxu1 %v691_v46  ;;  %v315_v30 = vld [vmem:[%s1264_s2 + $0x1a8] sm:$0xff]  ;;  %v317_v31 = vld [vmem:[%s1264_s2 + $0x1b8] sm:$0xff]  ;;  %v771_v33 = vpack.c.bf16 %v312_v27, %v310_v25  ;;  %v709_v34 = vpack.c.bf16 %v385_v29, %v383_v28  ;;  %v382_v35 = vld [vmem:[%s1265_s3 + $0x1a0] sm:$0xff] }
  0x2a   : > { %756 = vmatpush1.bf16.msra.mxu0 %v755_v47  ;;  %694 = vmatprep.subr.bf16.mxu1 %v693_v48  ;;  %v384_v36 = vld [vmem:[%s1265_s3 + $0x1b0] sm:$0xff]  ;;  %v314_v37 = vld [vmem:[%s1264_s2 + $0x1a0] sm:$0xff]  ;;  %v773_v38 = vpack.c.bf16 %v317_v31, %v315_v30  ;;  %v387_v40 = vld [vmem:[%s1265_s3 + $0x1c8] sm:$0xff] }
  0x2b   : > { %758 = vmatprep.subr.bf16.mxu0 %v757_v52  ;;  %v316_v39 = vld [vmem:[%s1264_s2 + $0x1b0] sm:$0xff]  ;;  %v389_v41 = vld [vmem:[%s1265_s3 + $0x1d8] sm:$0xff]  ;;  %v319_v42 = vld [vmem:[%s1264_s2 + $0x1c8] sm:$0xff]  ;;  %v711_v44 = vpack.c.bf16 %v384_v36, %v382_v35 }
  0x2c   : > { %v321_v43 = vld [vmem:[%s1264_s2 + $0x1d8] sm:$0xff]  ;;  %v775_v45 = vpack.c.bf16 %v316_v39, %v314_v37  ;;  %v713_v46 = vpack.c.bf16 %v389_v41, %v387_v40  ;;  %v386_v47 = vld [vmem:[%s1265_s3 + $0x1c0] sm:$0xff]  ;;  %v388_v48 = vld [vmem:[%s1265_s3 + $0x1d0] sm:$0xff] }
  0x2d   : > { %696 = vmatpush1.bf16.msra.mxu1 %v695_v58  ;;  %v318_v49 = vld [vmem:[%s1264_s2 + $0x1c0] sm:$0xff]  ;;  %v777_v50 = vpack.c.bf16 %v321_v43, %v319_v42  ;;  %v320_v51 = vld [vmem:[%s1264_s2 + $0x1d0] sm:$0xff]  ;;  %v391_v52 = vld [vmem:[%s1265_s3 + $0x1e8] sm:$0xff]  ;;  %v715_v56 = vpack.c.bf16 %v388_v48, %v386_v47 }
  0x2e   : > { %760 = vmatpush1.bf16.msra.mxu0 %v759_v59  ;;  %698 = vmatprep.subr.bf16.mxu1 %v697_v60  ;;  %v393_v53 = vld [vmem:[%s1265_s3 + $0x1f8] sm:$0xff]  ;;  %v323_v54 = vld [vmem:[%s1264_s2 + $0x1e8] sm:$0xff]  ;;  %v779_v57 = vpack.c.bf16 %v320_v51, %v318_v49  ;;  %v390_v59 = vld [vmem:[%s1265_s3 + $0x1e0] sm:$0xff] }
  0x2f   : > { %762 = vmatprep.subr.bf16.mxu0 %v761_v0  ;;  %v325_v55 = vld [vmem:[%s1264_s2 + $0x1f8] sm:$0xff]  ;;  %v717_v58 = vpack.c.bf16 %v393_v53, %v391_v52  ;;  %v392_v60 = vld [vmem:[%s1265_s3 + $0x1f0] sm:$0xff]  ;;  %v322_v62 = vld [vmem:[%s1264_s2 + $0x1e0] sm:$0xff] }
  0x30   : > { %v781_v61 = vpack.c.bf16 %v325_v55, %v323_v54  ;;  %v324_v63 = vld [vmem:[%s1264_s2 + $0x1f0] sm:$0xff]  ;;  %v719_v0 = vpack.c.bf16 %v392_v60, %v390_v59  ;;  %v326_v2 = vld [vmem:[%s1128_s22] sm:$0xff]  ;;  %v329_v4 = vld [vmem:[%s1128_s22 + $0x18] sm:$0xff] }
  0x31   : > { %700 = vmatpush1.bf16.msra.mxu1 %v699_v6  ;;  %v783_v1 = vpack.c.bf16 %v324_v63, %v322_v62  ;;  %v258_v3 = vld [vmem:[%s1137_s28] sm:$0xff]  ;;  %v261_v5 = vld [vmem:[%s1137_s28 + $0x18] sm:$0xff]  ;;  %v328_v6 = vld [vmem:[%s1128_s22 + $0x10] sm:$0xff] }
  0x32   : > { %764 = vmatpush1.bf16.msra.mxu0 %v763_v8  ;;  %702 = vmatprep.subr.bf16.mxu1 %v701_v9  ;;  %v260_v7 = vld [vmem:[%s1137_s28 + $0x10] sm:$0xff]  ;;  %v550_v8 = vlaneseq  ;;  %v548_v11 = vld [vmem:[%s1266_s4] sm:$0x3]  ;;  %s256_s28 = scalar_lea.vmem %s1267_s5, %s1098_s27 }
  0x33   : > { %766 = vmatprep.subr.bf16.mxu0 %v765_v13 }
  0x34   : > { %v551_v9 = vshrl.u32 %v550_v8, 7 }
  0x35   : > { %704 = vmatpush1.bf16.msra.mxu1 %v703_v20 }
  0x36   : > { %768 = vmatpush1.bf16.msra.mxu0 %v767_v21  ;;  %706 = vmatprep.subr.bf16.mxu1 %v705_v22  ;;  %v552_v10 = vsub.s32 0, %v551_v9  ;;  %v556_v12 = vsub.s32 1, %v551_v9 }
  0x37   : > { %770 = vmatprep.subr.bf16.mxu0 %v769_v26 }
  0x38   : > { %v553_v14 = vrot.slane %v548_v11, %v552_v10  ;;  %v557_v17 = vrot.slane %v548_v11, %v556_v12 }
  0x39   : > { %708 = vmatpush1.bf16.msra.mxu1 %v707_v32 }
  0x3a   : > { %772 = vmatpush1.bf16.msra.mxu0 %v771_v33  ;;  %710 = vmatprep.subr.bf16.mxu1 %v709_v34 }
  0x3b   : > { %774 = vmatprep.subr.bf16.mxu0 %v773_v38 }
  0x3d   : > { %712 = vmatpush1.bf16.msra.mxu1 %v711_v44 }
  0x3e   : > { %776 = vmatpush1.bf16.msra.mxu0 %v775_v45  ;;  %714 = vmatprep.subr.bf16.mxu1 %v713_v46 }
  0x3f   : > { %778 = vmatprep.subr.bf16.mxu0 %v777_v50 }
  0x41   : > { %716 = vmatpush1.bf16.msra.mxu1 %v715_v56 }
  0x42   : > { %780 = vmatpush1.bf16.msra.mxu0 %v779_v57  ;;  %718 = vmatprep.subr.bf16.mxu1 %v717_v58 }
  0x43   : > { %782 = vmatprep.subr.bf16.mxu0 %v781_v61 }
  0x45   : > { %720 = vmatpush1.bf16.msra.mxu1 %v719_v0 }
  0x46   : > { %784 = vmatpush1.bf16.msra.mxu0 %v783_v1 }
  0x48   : > { %459 = vmatmul.mubr.f32.vlgmr.msra.gmra.mrb[0].mxu1 %v326_v2 }
  0x49   : > { %536 = vmatmul.mubr.f32.vlgmr.msra.gmra.mrb[0].mxu0 %v258_v3  ;;  %464 = vmatprep.mubr.f32.mxu1 %v329_v4 }
  0x4a   : > { %541 = vmatprep.mubr.f32.mxu0 %v261_v5 }
  0x4c   : > { %465 = vmatmul.mubr.f32.gmra.mrb[2].mxu1 %v328_v6 }
  0x4d   : > { %542 = vmatmul.mubr.f32.gmra.mrb[2].mxu0 %v260_v7 }
 0x11b   : > { %v460_v13 = vpop.f32.mrb[0].mxu1 }
 0x11c   : > { %v537_v15 = vpop.f32.mrb[0].mxu0  ;;  %v462_v16 = vpop.f32.mrb[1].mxu1 }
 0x11d   : > { %v538_v18 = vadd.f32 %v537_v15, %v460_v13  ;;  %v539_v19 = vpop.f32.mrb[1].mxu0 }
 0x11e   : > { %v540_v20 = vadd.f32 %v539_v19, %v462_v16 }
 0x11f   : > { %v560_v21 = vadd.f32 %v553_v14, %v538_v18  ;;  %v466_v22 = vpop.f32.mrb[2].mxu1 }
 0x120   : > { %v561_v23 = vadd.f32 %v557_v17, %v540_v20  ;;  %v543_v24 = vpop.f32.mrb[2].mxu0  ;;  %v468_v25 = vpop.f32.mrb[3].mxu1 }
 0x121   : > { %564 = vst [vmem:[%s256_s28] sm:$0xff] %v560_v21  ;;  %v544_v26 = vadd.f32 %v543_v24, %v466_v22  ;;  %v545_v27 = vpop.f32.mrb[3].mxu0 }
 0x122   : > { %565 = vst [vmem:[%s256_s28 + $0x8] sm:$0xff] %v561_v23  ;;  %v546_v28 = vadd.f32 %v545_v27, %v468_v25 }
 0x123   : > { %v562_v29 = vadd.f32 %v553_v14, %v544_v26 }
 0x124   : > { %v563_v30 = vadd.f32 %v557_v17, %v546_v28 }
 0x125   : > { %566 = vst [vmem:[%s256_s28 + $0x10] sm:$0xff] %v562_v29 }
 0x126   : > { %567 = vst [vmem:[%s256_s28 + $0x18] sm:$0xff] %v563_v30 }
 0x127 PF: > { %s15_s18 = sadd.s32 1, %s803_s18  }
 0x128   : > { %p12_p4 = scmp.ge.s32.totalorder %s15_s18, 6  }
 0x12a   :  { %14 = sbr.rel (!%p12_p4) target bundleno = 1 (0x1), region = 73 }

</bundles_post_ra>
